<compile_context>
chip_gen: v7x
topology: tpu7x:2x2x1
jax: 0.10.0
libtpu: 0.0.40
codegen_flags: <defaults>
</compile_context>

<pallas_src>
import functools

import jax
import jax.numpy as jnp
from jax.experimental import pallas as pl
from jax.experimental.pallas import tpu as pltpu


# ------------------------------------------------------------------ tiling helpers

_VMEM_LIMIT = 48 * 1024 * 1024        # explicit scoped-VMEM limit: < v7x 64 MiB physical
_VMEM_BUDGET = 24 * 1024 * 1024       # conservative working-set target for tile picking


def _round_up(x, m):
    return (x + m - 1) // m * m


def _pick_tm(M, in_row_bytes, out_row_bytes, resident_bytes,
             *, budget=_VMEM_BUDGET, max_tm=1024):
    """Largest multiple-of-16 M-tile whose double-buffered streaming tiles plus the
    resident (weight/bias) blocks fit a budget that is safe on v7x (64 MiB physical)
    as well as v5e/v6e; capped so the M grid has >= 2 tiles for v7x's two TensorCores."""
    avail = max(budget - resident_bytes, 2 * 1024 * 1024)
    per_row = 2 * (in_row_bytes + out_row_bytes)          # 2x-buffered in-row + out-row
    tm = max(16, min(max_tm, (avail // per_row) // 16 * 16))
    half_m = _round_up(max(1, (M + 1) // 2), 16)          # keep >= 2 tiles when possible
    return max(16, min(tm, half_m))


def _pad_rows(a, M_pad, fill=0):
    M = a.shape[0]
    if M_pad == M:
        return a
    pad = [(0, M_pad - M)] + [(0, 0)] * (a.ndim - 1)
    return jnp.pad(a, pad, constant_values=fill)


def _pad_weight_rows(w, K_pad):
    if w.shape[0] == K_pad:
        return w
    return jnp.pad(w, ((0, K_pad - w.shape[0]), (0, 0)))


def _compiler_params():
    return pltpu.CompilerParams(dimension_semantics=("parallel",),
                                vmem_limit_bytes=_VMEM_LIMIT)


# ----------------------------------------------------------------------------- kernels

def _matmul_kernel(x_ref, w_ref, b_ref, o_ref, *, act, negative_slope=0.01):
    y = jnp.dot(x_ref[...], w_ref[...], preferred_element_type=jnp.float32) + b_ref[...]
    if act == "leaky":
        y = jnp.maximum(y, negative_slope * y)
    elif act == "relu":
        y = jnp.maximum(y, 0.0)
    o_ref[...] = y.astype(o_ref.dtype)


def _matmul_residual_kernel(x_ref, w_ref, b_ref, r_ref, o_ref, *, act, negative_slope=0.01):
    y = jnp.dot(x_ref[...], w_ref[...], preferred_element_type=jnp.float32)
    y = y + b_ref[...] + r_ref[...].astype(jnp.float32)
    if act == "leaky":
        y = jnp.maximum(y, negative_slope * y)
    o_ref[...] = y.astype(o_ref.dtype)


def _switched_hard_kernel(p_ref, wcat_ref, cw_ref, cb_ref, b_ref, o_ref, *,
                          breadth, n_out, c_off, c_in, negative_slope):
    """Fused SwitchedConvHardRouting tile:
       p_ref    (tm, K)            bf16 im2col patches
       wcat_ref (K, breadth*n_out) bf16 branch weights concatenated along N (resident)
       cw_ref   (c_in, breadth)    bf16 coupler 1x1 weight (resident)
       cb_ref   (1, breadth)       f32 coupler bias
       b_ref    (1, n_out)         f32 conv bias
    """
    p = p_ref[...]                                               # (tm, K) bf16

    # Fused coupler: the 1x1 strided coupler input is exactly the patch centre tap.
    center = p[:, c_off:c_off + c_in]                            # (tm, c_in)
    logits = jnp.dot(center, cw_ref[...],
                     preferred_element_type=jnp.float32) + cb_ref[...]   # (tm, breadth)
    mx = jnp.max(logits, axis=-1, keepdims=True)                 # (tm, 1)

    # Single lane-dense matmul against all branches at once (full MXU columns).
    full = jnp.dot(p, wcat_ref[...],
                   preferred_element_type=jnp.float32)           # (tm, breadth*n_out)

    # First-argmax one-hot selection (torch tie-break), reduced to (tm, n_out) on the VPU.
    y = jnp.zeros((p.shape[0], n_out), jnp.float32)
    any_prev = None
    for b in range(breadth):
        is_max_b = logits[:, b:b + 1] >= mx
        hit = is_max_b if any_prev is None else (is_max_b & jnp.logical_not(any_prev))
        y = y + jnp.where(hit, full[:, b * n_out:(b + 1) * n_out], 0.0)
        any_prev = is_max_b if any_prev is None else (any_prev | is_max_b)

    y = y + b_ref[...]                       # one-hot routing -> bias applied exactly once
    if negative_slope is not None:
        y = jnp.maximum(y, negative_slope * y)
    o_ref[...] = y.astype(o_ref.dtype)


def _leaky_kernel(x_ref, o_ref, *, negative_slope):
    x = x_ref[...].astype(jnp.float32)
    o_ref[...] = jnp.maximum(x, negative_slope * x)


# ------------------------------------------------------------------------ pallas wrappers

def pallas_matmul_bias(x, w, b, act=None, negative_slope=0.01, out_dtype=jnp.float32):
    """x (M, K) bf16, w (K, N) bf16, b (N,) f32 -> (M, N) out_dtype, M-tiled grid."""
    M, K = x.shape
    N = w.shape[1]
    out_bytes = jnp.dtype(out_dtype).itemsize
    resident = 2 * (K * N * 2 + N * 4)                      # weight + bias (double-buffered)
    tm = _pick_tm(M, K * 2, N * out_bytes, resident)
    M_pad = _round_up(M, tm)
    xp = _pad_rows(x, M_pad)
    out = pl.pallas_call(
        functools.partial(_matmul_kernel, act=act, negative_slope=negative_slope),
        out_shape=jax.ShapeDtypeStruct((M_pad, N), out_dtype),
        grid=(M_pad // tm,),
        in_specs=[pl.BlockSpec((tm, K), lambda i: (i, 0)),
                  pl.BlockSpec((K, N), lambda i: (0, 0)),
                  pl.BlockSpec((1, N), lambda i: (0, 0))],
        out_specs=pl.BlockSpec((tm, N), lambda i: (i, 0)),
        compiler_params=_compiler_params(),
    )(xp, w, b.reshape(1, N))
    return out[:M]


def pallas_matmul_bias_residual(x, w, b, resid, act=None, negative_slope=0.01,
                                out_dtype=jnp.float32):
    """Conv1x1 + bias + residual (+ optional fused LeakyReLU), M-tiled."""
    M, K = x.shape
    N = w.shape[1]
    r_bytes = jnp.dtype(resid.dtype).itemsize
    out_bytes = jnp.dtype(out_dtype).itemsize
    resident = 2 * (K * N * 2 + N * 4)
    tm = _pick_tm(M, K * 2 + N * r_bytes, N * out_bytes, resident)
    M_pad = _round_up(M, tm)
    xp = _pad_rows(x, M_pad)
    rp = _pad_rows(resid, M_pad)
    out = pl.pallas_call(
        functools.partial(_matmul_residual_kernel, act=act, negative_slope=negative_slope),
        out_shape=jax.ShapeDtypeStruct((M_pad, N), out_dtype),
        grid=(M_pad // tm,),
        in_specs=[pl.BlockSpec((tm, K), lambda i: (i, 0)),
                  pl.BlockSpec((K, N), lambda i: (0, 0)),
                  pl.BlockSpec((1, N), lambda i: (0, 0)),
                  pl.BlockSpec((tm, N), lambda i: (i, 0))],
        out_specs=pl.BlockSpec((tm, N), lambda i: (i, 0)),
        compiler_params=_compiler_params(),
    )(xp, w, b.reshape(1, N), rp)
    return out[:M]


def pallas_switched_conv_hard(patches, w_cat, cw, cb, bias, *, c_off, c_in,
                              negative_slope, out_dtype):
    """patches (M, K) bf16, w_cat (K, breadth*N) bf16, cw (c_in, breadth) bf16,
    cb (breadth,) f32, bias (N,) f32 -> (M, N) out_dtype."""
    M, K = patches.shape
    breadth = cw.shape[1]
    n_cat = w_cat.shape[1]
    n_out = n_cat // breadth
    out_bytes = jnp.dtype(out_dtype).itemsize
    resident = 2 * (K * n_cat * 2 + c_in * breadth * 2 + breadth * 4 + n_out * 4)
    tm = _pick_tm(M, K * 2, n_out * out_bytes, resident)
    M_pad = _round_up(M, tm)
    pp = _pad_rows(patches, M_pad)          # padded rows are all-zero -> discarded below
    out = pl.pallas_call(
        functools.partial(_switched_hard_kernel, breadth=breadth, n_out=n_out,
                          c_off=c_off, c_in=c_in, negative_slope=negative_slope),
        out_shape=jax.ShapeDtypeStruct((M_pad, n_out), out_dtype),
        grid=(M_pad // tm,),
        in_specs=[pl.BlockSpec((tm, K), lambda i: (i, 0)),
                  pl.BlockSpec((K, n_cat), lambda i: (0, 0)),
                  pl.BlockSpec((c_in, breadth), lambda i: (0, 0)),
                  pl.BlockSpec((1, breadth), lambda i: (0, 0)),
                  pl.BlockSpec((1, n_out), lambda i: (0, 0))],
        out_specs=pl.BlockSpec((tm, n_out), lambda i: (i, 0)),
        compiler_params=_compiler_params(),
    )(pp, w_cat, cw, cb.reshape(1, breadth), bias.reshape(1, n_out))
    return out[:M]


def pallas_leaky(x2d, negative_slope):
    """Standalone LeakyReLU (only used when there is nothing to fuse it into)."""
    M, C = x2d.shape
    tm = _pick_tm(M, C * jnp.dtype(x2d.dtype).itemsize, C * 4, 0)
    M_pad = _round_up(M, tm)
    xp = _pad_rows(x2d, M_pad)
    out = pl.pallas_call(
        functools.partial(_leaky_kernel, negative_slope=negative_slope),
        out_shape=jax.ShapeDtypeStruct((M_pad, C), jnp.float32),
        grid=(M_pad // tm,),
        in_specs=[pl.BlockSpec((tm, C), lambda i: (i, 0))],
        out_specs=pl.BlockSpec((tm, C), lambda i: (i, 0)),
        compiler_params=_compiler_params(),
    )(xp)
    return out[:M]


# ------------------------------------------------------------------------------ glue

def extract_patches(x, k, stride, pad):
    """x: (B, H, W, C) NHWC -> (B*Ho*Wo, round_up(k*k*C, 8)) bf16 patch matrix
    (feature order ky, kx, c; zero-padded K tail matches the zero-padded weight rows)."""
    B, H, W, C = x.shape
    x = x.astype(jnp.bfloat16)                              # halve im2col HBM traffic
    xp = jnp.pad(x, ((0, 0), (pad, pad), (pad, pad), (0, 0)))
    Ho = (H + 2 * pad - k) // stride + 1
    Wo = (W + 2 * pad - k) // stride + 1
    cols = []
    for dy in range(k):
        for dx in range(k):
            cols.append(xp[:, dy:dy + (Ho - 1) * stride + 1:stride,
                              dx:dx + (Wo - 1) * stride + 1:stride, :])
    patches = jnp.stack(cols, axis=3).reshape(B * Ho * Wo, k * k * C)
    K = k * k * C
    K_pad = _round_up(K, 8)                                 # sublane-align K (cheap)
    if K_pad != K:
        patches = jnp.pad(patches, ((0, 0), (0, K_pad - K)))
    return patches, Ho, Wo


def switched_conv(x, sp, k, stride, hard_en, negative_slope, out_dtype):
    """SwitchedConvHardRouting (coupler_mode='standard', eval mode)."""
    B, H, W, C = x.shape
    patches, Ho, Wo = extract_patches(x, k, stride, k // 2)
    c_off = ((k // 2) * k + (k // 2)) * C        # centre tap == coupler's strided 1x1 input
    breadth = sp["coupler_w"].shape[1]
    n_out = sp["b"].shape[0]

    if hard_en:
        out = pallas_switched_conv_hard(
            patches, sp["w_cat"], sp["coupler_w"], sp["coupler_b"], sp["b"],
            c_off=c_off, c_in=C, negative_slope=negative_slope, out_dtype=out_dtype)
    else:
        # Soft routing fallback: dense weighted sum over branches (one concat matmul).
        center = patches[:, c_off:c_off + C]
        logits = pallas_matmul_bias(center, sp["coupler_w"], sp["coupler_b"])
        sel = jax.nn.softmax(logits, axis=-1)
        zero_b = jnp.zeros((breadth * n_out,), jnp.float32)
        full = pallas_matmul_bias(patches, sp["w_cat"], zero_b)         # (M, breadth*n_out)
        out = sum(sel[:, b:b + 1] * full[:, b * n_out:(b + 1) * n_out]
                  for b in range(breadth))
        out = out + sp["b"][None, :]
        if negative_slope is not None:
            out = jnp.maximum(out, negative_slope * out)
        out = out.astype(out_dtype)
    return out.reshape(B, Ho, Wo, n_out)


def res_block(x, rp, final_negative_slope=None):
    """ResBlock: ReLU -> Conv3x3 -> ReLU -> Conv1x1, + input (+ optional fused LeakyReLU)."""
    B, H, W, C = x.shape
    x2d = x.reshape(-1, C)                                   # residual (bf16 or f32)
    h = jnp.maximum(x, 0)                                    # pre-ReLU fuses into im2col
    patches, _, _ = extract_patches(h, 3, 1, 1)
    # Conv3x3 + fused ReLU, emitted bf16 (it feeds the 1x1 matmul directly)
    y = pallas_matmul_bias(patches, rp["w1"], rp["b1"], act="relu", out_dtype=jnp.bfloat16)
    out2d = pallas_matmul_bias_residual(                     # Conv1x1 + residual (+ leaky)
        y, rp["w2"], rp["b2"], x2d,
        act=("leaky" if final_negative_slope is not None else None),
        negative_slope=(final_negative_slope if final_negative_slope is not None else 0.01))
    return out2d.reshape(B, H, W, C)


def encoder_forward(params, x_nchw, cfg):
    ns = 0.01  # nn.LeakyReLU default negative_slope
    hard = bool(cfg["hard_enabled"])
    x = jnp.transpose(x_nchw, (0, 2, 3, 1)).astype(jnp.float32)          # NCHW -> NHWC
    B = x.shape[0]

    # Conv2d(in_ch, ch//2, 5, stride=2, pad=2) + LeakyReLU (fused); bf16 out -> next im2col
    p, Ho, Wo = extract_patches(x, 5, 2, 2)
    x = pallas_matmul_bias(p, params["conv1_w"], params["conv1_b"],
                           act="leaky", out_dtype=jnp.bfloat16)
    x = x.reshape(B, Ho, Wo, -1)

    # SwitchedConvHardRouting(ch//2, ch, 5, stride=2) + LeakyReLU (fused); bf16 out
    x = switched_conv(x, params["sc1"], k=5, stride=2, hard_en=hard,
                      negative_slope=ns, out_dtype=jnp.bfloat16)
    # SwitchedConvHardRouting(ch, ch, 3, stride=1) - no activation; bf16 out -> res blocks
    x = switched_conv(x, params["sc2"], k=3, stride=1, hard_en=hard,
                      negative_slope=None, out_dtype=jnp.bfloat16)

    n_res = len(params["res"])
    for i, rp in enumerate(params["res"]):
        # final encoder LeakyReLU is fused into the last ResBlock's residual kernel
        x = res_block(x, rp, final_negative_slope=(ns if i == n_res - 1 else None))
    if n_res == 0:
        Bh, Hh, Wh, Ch = x.shape
        x = pallas_leaky(x.reshape(-1, Ch), ns).reshape(Bh, Hh, Wh, Ch)

    return jnp.transpose(x, (0, 3, 1, 2)).astype(jnp.float32)            # back to NCHW


def init_params(key, in_channel, channel, n_res_block, n_res_channel, breadth):
    keys = iter(jax.random.split(key, 64))

    def nrm(shape, scale=0.05):
        return scale * jax.random.normal(next(keys), shape, jnp.float32)

    def conv_w(out_c, in_c, k):
        # torch weight (O, I, k, k) -> (round_up(k*k*I, 8), O) bf16, feature order ky,kx,c
        w = nrm((out_c, in_c, k, k))
        w2 = jnp.transpose(w, (2, 3, 1, 0)).reshape(k * k * in_c, out_c)
        w2 = _pad_weight_rows(w2, _round_up(k * k * in_c, 8))
        return w2.astype(jnp.bfloat16)

    params = {"conv1_w": conv_w(channel // 2, in_channel, 5),
              "conv1_b": nrm((channel // 2,))}

    def switched(in_c, out_c, k):
        cw = nrm((breadth, in_c, 1, 1))                          # coupler 1x1 conv
        w = nrm((out_c, in_c, breadth, k, k))                    # torch (O, I, B, k, k)
        per_branch = jnp.transpose(w, (2, 3, 4, 1, 0)).reshape(breadth, k * k * in_c, out_c)
        # concat branch weights along N: w_cat[:, b*out_c:(b+1)*out_c] == branch b weight
        w_cat = jnp.transpose(per_branch, (1, 0, 2)).reshape(k * k * in_c, breadth * out_c)
        w_cat = _pad_weight_rows(w_cat, _round_up(k * k * in_c, 8))
        return {
            "coupler_w": jnp.transpose(cw.reshape(breadth, in_c)).astype(jnp.bfloat16),
            "coupler_b": nrm((breadth,)),
            "w_cat": w_cat.astype(jnp.bfloat16),
            "b": nrm((out_c,)),
        }

    params["sc1"] = switched(channel // 2, channel, 5)
    params["sc2"] = switched(channel, channel, 3)

    params["res"] = []
    for _ in range(n_res_block):
        params["res"].append({
            "w1": conv_w(n_res_channel, channel, 3),
            "b1": nrm((n_res_channel,)),
            "w2": conv_w(channel, n_res_channel, 1),
            "b2": nrm((channel,)),
        })
    return params


if __name__ == "__main__":
    # Small, deterministic config (stride=4 path exercises both switched convs).
    in_channel, channel = 3, 32
    n_res_block, n_res_channel = 2, 8
    cfg = {"breadth": 4, "mode": "standard", "dropout": 0.4, "hard_enabled": True}

    key = jax.random.PRNGKey(0)
    pkey, xkey = jax.random.split(key)
    params = init_params(pkey, in_channel, channel, n_res_block, n_res_channel, cfg["breadth"])
    x = jax.random.normal(xkey, (2, in_channel, 16, 16), jnp.float32)    # NCHW input

    fwd = jax.jit(lambda p, xi: encoder_forward(p, xi, cfg))
    out = jax.block_until_ready(fwd(params, x))

    assert out.shape == (2, channel, 4, 4), out.shape
    assert bool(jnp.all(jnp.isfinite(out)))
    print("KERNEL_OK")
</pallas_src>

<mosaic_0001>
module attributes {stable_mosaic.version = 11 : i64} {
  func.func @_matmul_kernel(%arg0: i32, %arg1: memref<64x80xbf16, #tpu.memory_space<vmem>>, %arg2: memref<80x16xbf16, #tpu.memory_space<vmem>>, %arg3: memref<1x16xf32, #tpu.memory_space<vmem>>, %arg4: memref<64x16xbf16, #tpu.memory_space<vmem>>) attributes {dimension_semantics = [#tpu.dimension_semantics<parallel>], iteration_bounds = array<i64: 2>, scalar_prefetch = 0 : i64, scratch_operands = 0 : i64, tpu.core_type = #tpu.core_type<tc>, window_params = [{transform_indices = @transform_0, window_bounds = array<i64: 64, 80>}, {pipeline_mode = #tpu.pipeline_mode<synchronous>, transform_indices = @transform_1, window_bounds = array<i64: 80, 16>}, {pipeline_mode = #tpu.pipeline_mode<synchronous>, transform_indices = @transform_2, window_bounds = array<i64: 1, 16>}, {transform_indices = @transform_3, window_bounds = array<i64: 64, 16>}]} {
    %c0 = arith.constant 0 : index
    %c0_0 = arith.constant 0 : index
    %0 = vector.load %arg1[%c0, %c0_0] : memref<64x80xbf16, #tpu.memory_space<vmem>>, vector<64x80xbf16>
    %c0_1 = arith.constant 0 : index
    %c0_2 = arith.constant 0 : index
    %1 = vector.load %arg2[%c0_1, %c0_2] : memref<80x16xbf16, #tpu.memory_space<vmem>>, vector<80x16xbf16>
    %cst = arith.constant dense<0.000000e+00> : vector<64x16xf32>
    %2 = tpu.matmul %0, %1, %cst {dimension_numbers = #tpu.dot_dimension_numbers<[1], [0], [0], [1], [0, 0, 1, 1], [], []>} : vector<64x80xbf16>, vector<80x16xbf16>, vector<64x16xf32> -> vector<64x16xf32>
    %c0_3 = arith.constant 0 : index
    %c0_4 = arith.constant 0 : index
    %3 = vector.load %arg3[%c0_3, %c0_4] : memref<1x16xf32, #tpu.memory_space<vmem>>, vector<1x16xf32>
    %4 = vector.broadcast %3 : vector<1x16xf32> to vector<64x16xf32>
    %5 = arith.addf %2, %4 : vector<64x16xf32>
    %cst_5 = arith.constant 0.00999999977 : f32
    %6 = vector.broadcast %cst_5 : f32 to vector<64x16xf32>
    %7 = arith.mulf %6, %5 : vector<64x16xf32>
    %8 = arith.maximumf %5, %7 : vector<64x16xf32>
    %9 = arith.truncf %8 : vector<64x16xf32> to vector<64x16xbf16>
    %c0_6 = arith.constant 0 : index
    %c0_7 = arith.constant 0 : index
    %10 = vector.load %arg4[%c0_6, %c0_7] : memref<64x16xbf16, #tpu.memory_space<vmem>>, vector<64x16xbf16>
    tpu.vector_store %arg4[%c0_6, %c0_7], %9 {strides = array<i32>} : memref<64x16xbf16, #tpu.memory_space<vmem>>, vector<64x16xbf16>,
    return
  }
  func.func @transform_0(%arg0: i32) -> (i32, i32) {
    %c0_i32 = arith.constant 0 : i32
    %c0_i32_0 = arith.constant 0 : i32
    return %arg0, %c0_i32 : i32, i32
  }
  func.func @transform_1(%arg0: i32) -> (i32, i32) {
    %c0_i32 = arith.constant 0 : i32
    %c0_i32_0 = arith.constant 0 : i32
    %c0_i32_1 = arith.constant 0 : i32
    return %c0_i32, %c0_i32_0 : i32, i32
  }
  func.func @transform_2(%arg0: i32) -> (i32, i32) {
    %c0_i32 = arith.constant 0 : i32
    %c0_i32_0 = arith.constant 0 : i32
    %c0_i32_1 = arith.constant 0 : i32
    return %c0_i32, %c0_i32_0 : i32, i32
  }
  func.func @transform_3(%arg0: i32) -> (i32, i32) {
    %c0_i32 = arith.constant 0 : i32
    %c0_i32_0 = arith.constant 0 : i32
    return %arg0, %c0_i32 : i32, i32
  }
}

module attributes {stable_mosaic.version = 11 : i64} {
  func.func @_switched_hard_kernel(%arg0: i32, %arg1: memref<16x400xbf16, #tpu.memory_space<vmem>>, %arg2: memref<400x128xbf16, #tpu.memory_space<vmem>>, %arg3: memref<16x4xbf16, #tpu.memory_space<vmem>>, %arg4: memref<1x4xf32, #tpu.memory_space<vmem>>, %arg5: memref<1x32xf32, #tpu.memory_space<vmem>>, %arg6: memref<16x32xbf16, #tpu.memory_space<vmem>>) attributes {dimension_semantics = [#tpu.dimension_semantics<parallel>], iteration_bounds = array<i64: 2>, scalar_prefetch = 0 : i64, scratch_operands = 0 : i64, tpu.core_type = #tpu.core_type<tc>, window_params = [{transform_indices = @transform_0, window_bounds = array<i64: 16, 400>}, {pipeline_mode = #tpu.pipeline_mode<synchronous>, transform_indices = @transform_1, window_bounds = array<i64: 400, 128>}, {pipeline_mode = #tpu.pipeline_mode<synchronous>, transform_indices = @transform_2, window_bounds = array<i64: 16, 4>}, {pipeline_mode = #tpu.pipeline_mode<synchronous>, transform_indices = @transform_3, window_bounds = array<i64: 1, 4>}, {pipeline_mode = #tpu.pipeline_mode<synchronous>, transform_indices = @transform_4, window_bounds = array<i64: 1, 32>}, {transform_indices = @transform_5, window_bounds = array<i64: 16, 32>}]} {
    %c0 = arith.constant 0 : index
    %c0_0 = arith.constant 0 : index
    %0 = vector.load %arg1[%c0, %c0_0] : memref<16x400xbf16, #tpu.memory_space<vmem>>, vector<16x400xbf16>
    %1 = vector.extract_strided_slice %0 {offsets = [0, 192], sizes = [16, 16], strides = [1, 1]} : vector<16x400xbf16> to vector<16x16xbf16>
    %c0_1 = arith.constant 0 : index
    %c0_2 = arith.constant 0 : index
    %2 = vector.load %arg3[%c0_1, %c0_2] : memref<16x4xbf16, #tpu.memory_space<vmem>>, vector<16x4xbf16>
    %cst = arith.constant dense<0.000000e+00> : vector<16x4xf32>
    %3 = tpu.matmul %1, %2, %cst {dimension_numbers = #tpu.dot_dimension_numbers<[1], [0], [0], [1], [0, 0, 1, 1], [], []>} : vector<16x16xbf16>, vector<16x4xbf16>, vector<16x4xf32> -> vector<16x4xf32>
    %c0_3 = arith.constant 0 : index
    %c0_4 = arith.constant 0 : index
    %4 = vector.load %arg4[%c0_3, %c0_4] : memref<1x4xf32, #tpu.memory_space<vmem>>, vector<1x4xf32>
    %5 = vector.broadcast %4 : vector<1x4xf32> to vector<16x4xf32>
    %6 = arith.addf %3, %5 : vector<16x4xf32>
    %cst_5 = arith.constant dense<0xFF800000> : vector<16xf32>
    %7 = vector.multi_reduction <maximumf>, %6, %cst_5 [1] : vector<16x4xf32> to vector<16xf32>
    %8 = vector.shape_cast %7 : vector<16xf32> to vector<16x1xf32>
    %c0_6 = arith.constant 0 : index
    %c0_7 = arith.constant 0 : index
    %9 = vector.load %arg2[%c0_6, %c0_7] : memref<400x128xbf16, #tpu.memory_space<vmem>>, vector<400x128xbf16>
    %cst_8 = arith.constant dense<0.000000e+00> : vector<16x128xf32>
    %10 = tpu.matmul %0, %9, %cst_8 {dimension_numbers = #tpu.dot_dimension_numbers<[1], [0], [0], [1], [0, 0, 1, 1], [], []>} : vector<16x400xbf16>, vector<400x128xbf16>, vector<16x128xf32> -> vector<16x128xf32>
    %cst_9 = arith.constant 0.000000e+00 : f32
    %11 = vector.broadcast %cst_9 : f32 to vector<16x32xf32>
    %12 = vector.extract_strided_slice %6 {offsets = [0, 0], sizes = [16, 1], strides = [1, 1]} : vector<16x4xf32> to vector<16x1xf32>
    %13 = arith.cmpf oge, %12, %8 : vector<16x1xf32>
    %14 = vector.extract_strided_slice %10 {offsets = [0, 0], sizes = [16, 32], strides = [1, 1]} : vector<16x128xf32> to vector<16x32xf32>
    %cst_10 = arith.constant 0.000000e+00 : f32
    %15 = vector.shape_cast %13 : vector<16x1xi1> to vector<16x1xi1>
    %16 = vector.broadcast %15 : vector<16x1xi1> to vector<16x32xi1>
    %17 = vector.broadcast %cst_10 : f32 to vector<16x32xf32>
    %18 = arith.select %16, %14, %17 : vector<16x32xi1>, vector<16x32xf32>
    %19 = arith.addf %11, %18 : vector<16x32xf32>
    %20 = vector.extract_strided_slice %6 {offsets = [0, 1], sizes = [16, 1], strides = [1, 1]} : vector<16x4xf32> to vector<16x1xf32>
    %21 = arith.cmpf oge, %20, %8 : vector<16x1xf32>
    %cst_11 = arith.constant dense<true> : vector<16x1xi1>
    %22 = arith.xori %13, %cst_11 : vector<16x1xi1>
    %23 = arith.andi %21, %22 : vector<16x1xi1>
    %24 = vector.extract_strided_slice %10 {offsets = [0, 32], sizes = [16, 32], strides = [1, 1]} : vector<16x128xf32> to vector<16x32xf32>
    %cst_12 = arith.constant 0.000000e+00 : f32
    %25 = vector.shape_cast %23 : vector<16x1xi1> to vector<16x1xi1>
    %26 = vector.broadcast %25 : vector<16x1xi1> to vector<16x32xi1>
    %27 = vector.broadcast %cst_12 : f32 to vector<16x32xf32>
    %28 = arith.select %26, %24, %27 : vector<16x32xi1>, vector<16x32xf32>
    %29 = arith.addf %19, %28 : vector<16x32xf32>
    %30 = arith.ori %13, %21 : vector<16x1xi1>
    %31 = vector.extract_strided_slice %6 {offsets = [0, 2], sizes = [16, 1], strides = [1, 1]} : vector<16x4xf32> to vector<16x1xf32>
    %32 = arith.cmpf oge, %31, %8 : vector<16x1xf32>
    %cst_13 = arith.constant dense<true> : vector<16x1xi1>
    %33 = arith.xori %30, %cst_13 : vector<16x1xi1>
    %34 = arith.andi %32, %33 : vector<16x1xi1>
    %35 = vector.extract_strided_slice %10 {offsets = [0, 64], sizes = [16, 32], strides = [1, 1]} : vector<16x128xf32> to vector<16x32xf32>
    %cst_14 = arith.constant 0.000000e+00 : f32
    %36 = vector.shape_cast %34 : vector<16x1xi1> to vector<16x1xi1>
    %37 = vector.broadcast %36 : vector<16x1xi1> to vector<16x32xi1>
    %38 = vector.broadcast %cst_14 : f32 to vector<16x32xf32>
    %39 = arith.select %37, %35, %38 : vector<16x32xi1>, vector<16x32xf32>
    %40 = arith.addf %29, %39 : vector<16x32xf32>
    %41 = arith.ori %30, %32 : vector<16x1xi1>
    %42 = vector.extract_strided_slice %6 {offsets = [0, 3], sizes = [16, 1], strides = [1, 1]} : vector<16x4xf32> to vector<16x1xf32>
    %43 = arith.cmpf oge, %42, %8 : vector<16x1xf32>
    %cst_15 = arith.constant dense<true> : vector<16x1xi1>
    %44 = arith.xori %41, %cst_15 : vector<16x1xi1>
    %45 = arith.andi %43, %44 : vector<16x1xi1>
    %46 = vector.extract_strided_slice %10 {offsets = [0, 96], sizes = [16, 32], strides = [1, 1]} : vector<16x128xf32> to vector<16x32xf32>
    %cst_16 = arith.constant 0.000000e+00 : f32
    %47 = vector.shape_cast %45 : vector<16x1xi1> to vector<16x1xi1>
    %48 = vector.broadcast %47 : vector<16x1xi1> to vector<16x32xi1>
    %49 = vector.broadcast %cst_16 : f32 to vector<16x32xf32>
    %50 = arith.select %48, %46, %49 : vector<16x32xi1>, vector<16x32xf32>
    %51 = arith.addf %40, %50 : vector<16x32xf32>
    %c0_17 = arith.constant 0 : index
    %c0_18 = arith.constant 0 : index
    %52 = vector.load %arg5[%c0_17, %c0_18] : memref<1x32xf32, #tpu.memory_space<vmem>>, vector<1x32xf32>
    %53 = vector.broadcast %52 : vector<1x32xf32> to vector<16x32xf32>
    %54 = arith.addf %51, %53 : vector<16x32xf32>
    %cst_19 = arith.constant 0.00999999977 : f32
    %55 = vector.broadcast %cst_19 : f32 to vector<16x32xf32>
    %56 = arith.mulf %55, %54 : vector<16x32xf32>
    %57 = arith.maximumf %54, %56 : vector<16x32xf32>
    %58 = arith.truncf %57 : vector<16x32xf32> to vector<16x32xbf16>
    %c0_20 = arith.constant 0 : index
    %c0_21 = arith.constant 0 : index
    %59 = vector.load %arg6[%c0_20, %c0_21] : memref<16x32xbf16, #tpu.memory_space<vmem>>, vector<16x32xbf16>
    tpu.vector_store %arg6[%c0_20, %c0_21], %58 {strides = array<i32>} : memref<16x32xbf16, #tpu.memory_space<vmem>>, vector<16x32xbf16>,
    return
  }
  func.func @transform_0(%arg0: i32) -> (i32, i32) {
    %c0_i32 = arith.constant 0 : i32
    %c0_i32_0 = arith.constant 0 : i32
    return %arg0, %c0_i32 : i32, i32
  }
  func.func @transform_1(%arg0: i32) -> (i32, i32) {
    %c0_i32 = arith.constant 0 : i32
    %c0_i32_0 = arith.constant 0 : i32
    %c0_i32_1 = arith.constant 0 : i32
    return %c0_i32, %c0_i32_0 : i32, i32
  }
  func.func @transform_2(%arg0: i32) -> (i32, i32) {
    %c0_i32 = arith.constant 0 : i32
    %c0_i32_0 = arith.constant 0 : i32
    %c0_i32_1 = arith.constant 0 : i32
    return %c0_i32, %c0_i32_0 : i32, i32
  }
  func.func @transform_3(%arg0: i32) -> (i32, i32) {
    %c0_i32 = arith.constant 0 : i32
    %c0_i32_0 = arith.constant 0 : i32
    %c0_i32_1 = arith.constant 0 : i32
    return %c0_i32, %c0_i32_0 : i32, i32
  }
  func.func @transform_4(%arg0: i32) -> (i32, i32) {
    %c0_i32 = arith.constant 0 : i32
    %c0_i32_0 = arith.constant 0 : i32
    %c0_i32_1 = arith.constant 0 : i32
    return %c0_i32, %c0_i32_0 : i32, i32
  }
  func.func @transform_5(%arg0: i32) -> (i32, i32) {
    %c0_i32 = arith.constant 0 : i32
    %c0_i32_0 = arith.constant 0 : i32
    return %arg0, %c0_i32 : i32, i32
  }
}

module attributes {stable_mosaic.version = 11 : i64} {
  func.func @_matmul_residual_kernel(%arg0: i32, %arg1: memref<16x8xbf16, #tpu.memory_space<vmem>>, %arg2: memref<8x32xbf16, #tpu.memory_space<vmem>>, %arg3: memref<1x32xf32, #tpu.memory_space<vmem>>, %arg4: memref<16x32xbf16, #tpu.memory_space<vmem>>, %arg5: memref<16x32xf32, #tpu.memory_space<vmem>>) attributes {dimension_semantics = [#tpu.dimension_semantics<parallel>], iteration_bounds = array<i64: 2>, scalar_prefetch = 0 : i64, scratch_operands = 0 : i64, tpu.core_type = #tpu.core_type<tc>, window_params = [{transform_indices = @transform_0, window_bounds = array<i64: 16, 8>}, {pipeline_mode = #tpu.pipeline_mode<synchronous>, transform_indices = @transform_1, window_bounds = array<i64: 8, 32>}, {pipeline_mode = #tpu.pipeline_mode<synchronous>, transform_indices = @transform_2, window_bounds = array<i64: 1, 32>}, {transform_indices = @transform_3, window_bounds = array<i64: 16, 32>}, {transform_indices = @transform_4, window_bounds = array<i64: 16, 32>}]} {
    %c0 = arith.constant 0 : index
    %c0_0 = arith.constant 0 : index
    %0 = vector.load %arg1[%c0, %c0_0] : memref<16x8xbf16, #tpu.memory_space<vmem>>, vector<16x8xbf16>
    %c0_1 = arith.constant 0 : index
    %c0_2 = arith.constant 0 : index
    %1 = vector.load %arg2[%c0_1, %c0_2] : memref<8x32xbf16, #tpu.memory_space<vmem>>, vector<8x32xbf16>
    %cst = arith.constant dense<0.000000e+00> : vector<16x32xf32>
    %2 = tpu.matmul %0, %1, %cst {dimension_numbers = #tpu.dot_dimension_numbers<[1], [0], [0], [1], [0, 0, 1, 1], [], []>} : vector<16x8xbf16>, vector<8x32xbf16>, vector<16x32xf32> -> vector<16x32xf32>
    %c0_3 = arith.constant 0 : index
    %c0_4 = arith.constant 0 : index
    %3 = vector.load %arg3[%c0_3, %c0_4] : memref<1x32xf32, #tpu.memory_space<vmem>>, vector<1x32xf32>
    %4 = vector.broadcast %3 : vector<1x32xf32> to vector<16x32xf32>
    %5 = arith.addf %2, %4 : vector<16x32xf32>
    %c0_5 = arith.constant 0 : index
    %c0_6 = arith.constant 0 : index
    %6 = vector.load %arg4[%c0_5, %c0_6] : memref<16x32xbf16, #tpu.memory_space<vmem>>, vector<16x32xbf16>
    %7 = arith.extf %6 : vector<16x32xbf16> to vector<16x32xf32>
    %8 = arith.addf %5, %7 : vector<16x32xf32>
    %c0_7 = arith.constant 0 : index
    %c0_8 = arith.constant 0 : index
    %9 = vector.load %arg5[%c0_7, %c0_8] : memref<16x32xf32, #tpu.memory_space<vmem>>, vector<16x32xf32>
    tpu.vector_store %arg5[%c0_7, %c0_8], %8 {strides = array<i32>} : memref<16x32xf32, #tpu.memory_space<vmem>>, vector<16x32xf32>,
    return
  }
  func.func @transform_0(%arg0: i32) -> (i32, i32) {
    %c0_i32 = arith.constant 0 : i32
    %c0_i32_0 = arith.constant 0 : i32
    return %arg0, %c0_i32 : i32, i32
  }
  func.func @transform_1(%arg0: i32) -> (i32, i32) {
    %c0_i32 = arith.constant 0 : i32
    %c0_i32_0 = arith.constant 0 : i32
    %c0_i32_1 = arith.constant 0 : i32
    return %c0_i32, %c0_i32_0 : i32, i32
  }
  func.func @transform_2(%arg0: i32) -> (i32, i32) {
    %c0_i32 = arith.constant 0 : i32
    %c0_i32_0 = arith.constant 0 : i32
    %c0_i32_1 = arith.constant 0 : i32
    return %c0_i32, %c0_i32_0 : i32, i32
  }
  func.func @transform_3(%arg0: i32) -> (i32, i32) {
    %c0_i32 = arith.constant 0 : i32
    %c0_i32_0 = arith.constant 0 : i32
    return %arg0, %c0_i32 : i32, i32
  }
  func.func @transform_4(%arg0: i32) -> (i32, i32) {
    %c0_i32 = arith.constant 0 : i32
    %c0_i32_0 = arith.constant 0 : i32
    return %arg0, %c0_i32 : i32, i32
  }
}

module attributes {stable_mosaic.version = 11 : i64} {
  func.func @_matmul_kernel(%arg0: i32, %arg1: memref<16x288xbf16, #tpu.memory_space<vmem>>, %arg2: memref<288x8xbf16, #tpu.memory_space<vmem>>, %arg3: memref<1x8xf32, #tpu.memory_space<vmem>>, %arg4: memref<16x8xbf16, #tpu.memory_space<vmem>>) attributes {dimension_semantics = [#tpu.dimension_semantics<parallel>], iteration_bounds = array<i64: 2>, scalar_prefetch = 0 : i64, scratch_operands = 0 : i64, tpu.core_type = #tpu.core_type<tc>, window_params = [{transform_indices = @transform_0, window_bounds = array<i64: 16, 288>}, {pipeline_mode = #tpu.pipeline_mode<synchronous>, transform_indices = @transform_1, window_bounds = array<i64: 288, 8>}, {pipeline_mode = #tpu.pipeline_mode<synchronous>, transform_indices = @transform_2, window_bounds = array<i64: 1, 8>}, {transform_indices = @transform_3, window_bounds = array<i64: 16, 8>}]} {
    %c0 = arith.constant 0 : index
    %c0_0 = arith.constant 0 : index
    %0 = vector.load %arg1[%c0, %c0_0] : memref<16x288xbf16, #tpu.memory_space<vmem>>, vector<16x288xbf16>
    %c0_1 = arith.constant 0 : index
    %c0_2 = arith.constant 0 : index
    %1 = vector.load %arg2[%c0_1, %c0_2] : memref<288x8xbf16, #tpu.memory_space<vmem>>, vector<288x8xbf16>
    %cst = arith.constant dense<0.000000e+00> : vector<16x8xf32>
    %2 = tpu.matmul %0, %1, %cst {dimension_numbers = #tpu.dot_dimension_numbers<[1], [0], [0], [1], [0, 0, 1, 1], [], []>} : vector<16x288xbf16>, vector<288x8xbf16>, vector<16x8xf32> -> vector<16x8xf32>
    %c0_3 = arith.constant 0 : index
    %c0_4 = arith.constant 0 : index
    %3 = vector.load %arg3[%c0_3, %c0_4] : memref<1x8xf32, #tpu.memory_space<vmem>>, vector<1x8xf32>
    %4 = vector.broadcast %3 : vector<1x8xf32> to vector<16x8xf32>
    %5 = arith.addf %2, %4 : vector<16x8xf32>
    %cst_5 = arith.constant 0.000000e+00 : f32
    %6 = vector.broadcast %cst_5 : f32 to vector<16x8xf32>
    %7 = arith.maximumf %5, %6 : vector<16x8xf32>
    %8 = arith.truncf %7 : vector<16x8xf32> to vector<16x8xbf16>
    %c0_6 = arith.constant 0 : index
    %c0_7 = arith.constant 0 : index
    %9 = vector.load %arg4[%c0_6, %c0_7] : memref<16x8xbf16, #tpu.memory_space<vmem>>, vector<16x8xbf16>
    tpu.vector_store %arg4[%c0_6, %c0_7], %8 {strides = array<i32>} : memref<16x8xbf16, #tpu.memory_space<vmem>>, vector<16x8xbf16>,
    return
  }
  func.func @transform_0(%arg0: i32) -> (i32, i32) {
    %c0_i32 = arith.constant 0 : i32
    %c0_i32_0 = arith.constant 0 : i32
    return %arg0, %c0_i32 : i32, i32
  }
  func.func @transform_1(%arg0: i32) -> (i32, i32) {
    %c0_i32 = arith.constant 0 : i32
    %c0_i32_0 = arith.constant 0 : i32
    %c0_i32_1 = arith.constant 0 : i32
    return %c0_i32, %c0_i32_0 : i32, i32
  }
  func.func @transform_2(%arg0: i32) -> (i32, i32) {
    %c0_i32 = arith.constant 0 : i32
    %c0_i32_0 = arith.constant 0 : i32
    %c0_i32_1 = arith.constant 0 : i32
    return %c0_i32, %c0_i32_0 : i32, i32
  }
  func.func @transform_3(%arg0: i32) -> (i32, i32) {
    %c0_i32 = arith.constant 0 : i32
    %c0_i32_0 = arith.constant 0 : i32
    return %arg0, %c0_i32 : i32, i32
  }
}

module attributes {stable_mosaic.version = 11 : i64} {
  func.func @_switched_hard_kernel(%arg0: i32, %arg1: memref<16x288xbf16, #tpu.memory_space<vmem>>, %arg2: memref<288x128xbf16, #tpu.memory_space<vmem>>, %arg3: memref<32x4xbf16, #tpu.memory_space<vmem>>, %arg4: memref<1x4xf32, #tpu.memory_space<vmem>>, %arg5: memref<1x32xf32, #tpu.memory_space<vmem>>, %arg6: memref<16x32xbf16, #tpu.memory_space<vmem>>) attributes {dimension_semantics = [#tpu.dimension_semantics<parallel>], iteration_bounds = array<i64: 2>, scalar_prefetch = 0 : i64, scratch_operands = 0 : i64, tpu.core_type = #tpu.core_type<tc>, window_params = [{transform_indices = @transform_0, window_bounds = array<i64: 16, 288>}, {pipeline_mode = #tpu.pipeline_mode<synchronous>, transform_indices = @transform_1, window_bounds = array<i64: 288, 128>}, {pipeline_mode = #tpu.pipeline_mode<synchronous>, transform_indices = @transform_2, window_bounds = array<i64: 32, 4>}, {pipeline_mode = #tpu.pipeline_mode<synchronous>, transform_indices = @transform_3, window_bounds = array<i64: 1, 4>}, {pipeline_mode = #tpu.pipeline_mode<synchronous>, transform_indices = @transform_4, window_bounds = array<i64: 1, 32>}, {transform_indices = @transform_5, window_bounds = array<i64: 16, 32>}]} {
    %c0 = arith.constant 0 : index
    %c0_0 = arith.constant 0 : index
    %0 = vector.load %arg1[%c0, %c0_0] : memref<16x288xbf16, #tpu.memory_space<vmem>>, vector<16x288xbf16>
    %1 = vector.extract_strided_slice %0 {offsets = [0, 128], sizes = [16, 32], strides = [1, 1]} : vector<16x288xbf16> to vector<16x32xbf16>
    %c0_1 = arith.constant 0 : index
    %c0_2 = arith.constant 0 : index
    %2 = vector.load %arg3[%c0_1, %c0_2] : memref<32x4xbf16, #tpu.memory_space<vmem>>, vector<32x4xbf16>
    %cst = arith.constant dense<0.000000e+00> : vector<16x4xf32>
    %3 = tpu.matmul %1, %2, %cst {dimension_numbers = #tpu.dot_dimension_numbers<[1], [0], [0], [1], [0, 0, 1, 1], [], []>} : vector<16x32xbf16>, vector<32x4xbf16>, vector<16x4xf32> -> vector<16x4xf32>
    %c0_3 = arith.constant 0 : index
    %c0_4 = arith.constant 0 : index
    %4 = vector.load %arg4[%c0_3, %c0_4] : memref<1x4xf32, #tpu.memory_space<vmem>>, vector<1x4xf32>
    %5 = vector.broadcast %4 : vector<1x4xf32> to vector<16x4xf32>
    %6 = arith.addf %3, %5 : vector<16x4xf32>
    %cst_5 = arith.constant dense<0xFF800000> : vector<16xf32>
    %7 = vector.multi_reduction <maximumf>, %6, %cst_5 [1] : vector<16x4xf32> to vector<16xf32>
    %8 = vector.shape_cast %7 : vector<16xf32> to vector<16x1xf32>
    %c0_6 = arith.constant 0 : index
    %c0_7 = arith.constant 0 : index
    %9 = vector.load %arg2[%c0_6, %c0_7] : memref<288x128xbf16, #tpu.memory_space<vmem>>, vector<288x128xbf16>
    %cst_8 = arith.constant dense<0.000000e+00> : vector<16x128xf32>
    %10 = tpu.matmul %0, %9, %cst_8 {dimension_numbers = #tpu.dot_dimension_numbers<[1], [0], [0], [1], [0, 0, 1, 1], [], []>} : vector<16x288xbf16>, vector<288x128xbf16>, vector<16x128xf32> -> vector<16x128xf32>
    %cst_9 = arith.constant 0.000000e+00 : f32
    %11 = vector.broadcast %cst_9 : f32 to vector<16x32xf32>
    %12 = vector.extract_strided_slice %6 {offsets = [0, 0], sizes = [16, 1], strides = [1, 1]} : vector<16x4xf32> to vector<16x1xf32>
    %13 = arith.cmpf oge, %12, %8 : vector<16x1xf32>
    %14 = vector.extract_strided_slice %10 {offsets = [0, 0], sizes = [16, 32], strides = [1, 1]} : vector<16x128xf32> to vector<16x32xf32>
    %cst_10 = arith.constant 0.000000e+00 : f32
    %15 = vector.shape_cast %13 : vector<16x1xi1> to vector<16x1xi1>
    %16 = vector.broadcast %15 : vector<16x1xi1> to vector<16x32xi1>
    %17 = vector.broadcast %cst_10 : f32 to vector<16x32xf32>
    %18 = arith.select %16, %14, %17 : vector<16x32xi1>, vector<16x32xf32>
    %19 = arith.addf %11, %18 : vector<16x32xf32>
    %20 = vector.extract_strided_slice %6 {offsets = [0, 1], sizes = [16, 1], strides = [1, 1]} : vector<16x4xf32> to vector<16x1xf32>
    %21 = arith.cmpf oge, %20, %8 : vector<16x1xf32>
    %cst_11 = arith.constant dense<true> : vector<16x1xi1>
    %22 = arith.xori %13, %cst_11 : vector<16x1xi1>
    %23 = arith.andi %21, %22 : vector<16x1xi1>
    %24 = vector.extract_strided_slice %10 {offsets = [0, 32], sizes = [16, 32], strides = [1, 1]} : vector<16x128xf32> to vector<16x32xf32>
    %cst_12 = arith.constant 0.000000e+00 : f32
    %25 = vector.shape_cast %23 : vector<16x1xi1> to vector<16x1xi1>
    %26 = vector.broadcast %25 : vector<16x1xi1> to vector<16x32xi1>
    %27 = vector.broadcast %cst_12 : f32 to vector<16x32xf32>
    %28 = arith.select %26, %24, %27 : vector<16x32xi1>, vector<16x32xf32>
    %29 = arith.addf %19, %28 : vector<16x32xf32>
    %30 = arith.ori %13, %21 : vector<16x1xi1>
    %31 = vector.extract_strided_slice %6 {offsets = [0, 2], sizes = [16, 1], strides = [1, 1]} : vector<16x4xf32> to vector<16x1xf32>
    %32 = arith.cmpf oge, %31, %8 : vector<16x1xf32>
    %cst_13 = arith.constant dense<true> : vector<16x1xi1>
    %33 = arith.xori %30, %cst_13 : vector<16x1xi1>
    %34 = arith.andi %32, %33 : vector<16x1xi1>
    %35 = vector.extract_strided_slice %10 {offsets = [0, 64], sizes = [16, 32], strides = [1, 1]} : vector<16x128xf32> to vector<16x32xf32>
    %cst_14 = arith.constant 0.000000e+00 : f32
    %36 = vector.shape_cast %34 : vector<16x1xi1> to vector<16x1xi1>
    %37 = vector.broadcast %36 : vector<16x1xi1> to vector<16x32xi1>
    %38 = vector.broadcast %cst_14 : f32 to vector<16x32xf32>
    %39 = arith.select %37, %35, %38 : vector<16x32xi1>, vector<16x32xf32>
    %40 = arith.addf %29, %39 : vector<16x32xf32>
    %41 = arith.ori %30, %32 : vector<16x1xi1>
    %42 = vector.extract_strided_slice %6 {offsets = [0, 3], sizes = [16, 1], strides = [1, 1]} : vector<16x4xf32> to vector<16x1xf32>
    %43 = arith.cmpf oge, %42, %8 : vector<16x1xf32>
    %cst_15 = arith.constant dense<true> : vector<16x1xi1>
    %44 = arith.xori %41, %cst_15 : vector<16x1xi1>
    %45 = arith.andi %43, %44 : vector<16x1xi1>
    %46 = vector.extract_strided_slice %10 {offsets = [0, 96], sizes = [16, 32], strides = [1, 1]} : vector<16x128xf32> to vector<16x32xf32>
    %cst_16 = arith.constant 0.000000e+00 : f32
    %47 = vector.shape_cast %45 : vector<16x1xi1> to vector<16x1xi1>
    %48 = vector.broadcast %47 : vector<16x1xi1> to vector<16x32xi1>
    %49 = vector.broadcast %cst_16 : f32 to vector<16x32xf32>
    %50 = arith.select %48, %46, %49 : vector<16x32xi1>, vector<16x32xf32>
    %51 = arith.addf %40, %50 : vector<16x32xf32>
    %c0_17 = arith.constant 0 : index
    %c0_18 = arith.constant 0 : index
    %52 = vector.load %arg5[%c0_17, %c0_18] : memref<1x32xf32, #tpu.memory_space<vmem>>, vector<1x32xf32>
    %53 = vector.broadcast %52 : vector<1x32xf32> to vector<16x32xf32>
    %54 = arith.addf %51, %53 : vector<16x32xf32>
    %55 = arith.truncf %54 : vector<16x32xf32> to vector<16x32xbf16>
    %c0_19 = arith.constant 0 : index
    %c0_20 = arith.constant 0 : index
    %56 = vector.load %arg6[%c0_19, %c0_20] : memref<16x32xbf16, #tpu.memory_space<vmem>>, vector<16x32xbf16>
    tpu.vector_store %arg6[%c0_19, %c0_20], %55 {strides = array<i32>} : memref<16x32xbf16, #tpu.memory_space<vmem>>, vector<16x32xbf16>,
    return
  }
  func.func @transform_0(%arg0: i32) -> (i32, i32) {
    %c0_i32 = arith.constant 0 : i32
    %c0_i32_0 = arith.constant 0 : i32
    return %arg0, %c0_i32 : i32, i32
  }
  func.func @transform_1(%arg0: i32) -> (i32, i32) {
    %c0_i32 = arith.constant 0 : i32
    %c0_i32_0 = arith.constant 0 : i32
    %c0_i32_1 = arith.constant 0 : i32
    return %c0_i32, %c0_i32_0 : i32, i32
  }
  func.func @transform_2(%arg0: i32) -> (i32, i32) {
    %c0_i32 = arith.constant 0 : i32
    %c0_i32_0 = arith.constant 0 : i32
    %c0_i32_1 = arith.constant 0 : i32
    return %c0_i32, %c0_i32_0 : i32, i32
  }
  func.func @transform_3(%arg0: i32) -> (i32, i32) {
    %c0_i32 = arith.constant 0 : i32
    %c0_i32_0 = arith.constant 0 : i32
    %c0_i32_1 = arith.constant 0 : i32
    return %c0_i32, %c0_i32_0 : i32, i32
  }
  func.func @transform_4(%arg0: i32) -> (i32, i32) {
    %c0_i32 = arith.constant 0 : i32
    %c0_i32_0 = arith.constant 0 : i32
    %c0_i32_1 = arith.constant 0 : i32
    return %c0_i32, %c0_i32_0 : i32, i32
  }
  func.func @transform_5(%arg0: i32) -> (i32, i32) {
    %c0_i32 = arith.constant 0 : i32
    %c0_i32_0 = arith.constant 0 : i32
    return %arg0, %c0_i32 : i32, i32
  }
}

module attributes {stable_mosaic.version = 11 : i64} {
  func.func @_matmul_residual_kernel(%arg0: i32, %arg1: memref<16x8xbf16, #tpu.memory_space<vmem>>, %arg2: memref<8x32xbf16, #tpu.memory_space<vmem>>, %arg3: memref<1x32xf32, #tpu.memory_space<vmem>>, %arg4: memref<16x32xf32, #tpu.memory_space<vmem>>, %arg5: memref<16x32xf32, #tpu.memory_space<vmem>>) attributes {dimension_semantics = [#tpu.dimension_semantics<parallel>], iteration_bounds = array<i64: 2>, scalar_prefetch = 0 : i64, scratch_operands = 0 : i64, tpu.core_type = #tpu.core_type<tc>, window_params = [{transform_indices = @transform_0, window_bounds = array<i64: 16, 8>}, {pipeline_mode = #tpu.pipeline_mode<synchronous>, transform_indices = @transform_1, window_bounds = array<i64: 8, 32>}, {pipeline_mode = #tpu.pipeline_mode<synchronous>, transform_indices = @transform_2, window_bounds = array<i64: 1, 32>}, {transform_indices = @transform_3, window_bounds = array<i64: 16, 32>}, {transform_indices = @transform_4, window_bounds = array<i64: 16, 32>}]} {
    %c0 = arith.constant 0 : index
    %c0_0 = arith.constant 0 : index
    %0 = vector.load %arg1[%c0, %c0_0] : memref<16x8xbf16, #tpu.memory_space<vmem>>, vector<16x8xbf16>
    %c0_1 = arith.constant 0 : index
    %c0_2 = arith.constant 0 : index
    %1 = vector.load %arg2[%c0_1, %c0_2] : memref<8x32xbf16, #tpu.memory_space<vmem>>, vector<8x32xbf16>
    %cst = arith.constant dense<0.000000e+00> : vector<16x32xf32>
    %2 = tpu.matmul %0, %1, %cst {dimension_numbers = #tpu.dot_dimension_numbers<[1], [0], [0], [1], [0, 0, 1, 1], [], []>} : vector<16x8xbf16>, vector<8x32xbf16>, vector<16x32xf32> -> vector<16x32xf32>
    %c0_3 = arith.constant 0 : index
    %c0_4 = arith.constant 0 : index
    %3 = vector.load %arg3[%c0_3, %c0_4] : memref<1x32xf32, #tpu.memory_space<vmem>>, vector<1x32xf32>
    %4 = vector.broadcast %3 : vector<1x32xf32> to vector<16x32xf32>
    %5 = arith.addf %2, %4 : vector<16x32xf32>
    %c0_5 = arith.constant 0 : index
    %c0_6 = arith.constant 0 : index
    %6 = vector.load %arg4[%c0_5, %c0_6] : memref<16x32xf32, #tpu.memory_space<vmem>>, vector<16x32xf32>
    %7 = arith.addf %5, %6 : vector<16x32xf32>
    %cst_7 = arith.constant 0.00999999977 : f32
    %8 = vector.broadcast %cst_7 : f32 to vector<16x32xf32>
    %9 = arith.mulf %8, %7 : vector<16x32xf32>
    %10 = arith.maximumf %7, %9 : vector<16x32xf32>
    %c0_8 = arith.constant 0 : index
    %c0_9 = arith.constant 0 : index
    %11 = vector.load %arg5[%c0_8, %c0_9] : memref<16x32xf32, #tpu.memory_space<vmem>>, vector<16x32xf32>
    tpu.vector_store %arg5[%c0_8, %c0_9], %10 {strides = array<i32>} : memref<16x32xf32, #tpu.memory_space<vmem>>, vector<16x32xf32>,
    return
  }
  func.func @transform_0(%arg0: i32) -> (i32, i32) {
    %c0_i32 = arith.constant 0 : i32
    %c0_i32_0 = arith.constant 0 : i32
    return %arg0, %c0_i32 : i32, i32
  }
  func.func @transform_1(%arg0: i32) -> (i32, i32) {
    %c0_i32 = arith.constant 0 : i32
    %c0_i32_0 = arith.constant 0 : i32
    %c0_i32_1 = arith.constant 0 : i32
    return %c0_i32, %c0_i32_0 : i32, i32
  }
  func.func @transform_2(%arg0: i32) -> (i32, i32) {
    %c0_i32 = arith.constant 0 : i32
    %c0_i32_0 = arith.constant 0 : i32
    %c0_i32_1 = arith.constant 0 : i32
    return %c0_i32, %c0_i32_0 : i32, i32
  }
  func.func @transform_3(%arg0: i32) -> (i32, i32) {
    %c0_i32 = arith.constant 0 : i32
    %c0_i32_0 = arith.constant 0 : i32
    return %arg0, %c0_i32 : i32, i32
  }
  func.func @transform_4(%arg0: i32) -> (i32, i32) {
    %c0_i32 = arith.constant 0 : i32
    %c0_i32_0 = arith.constant 0 : i32
    return %arg0, %c0_i32 : i32, i32
  }
}

</mosaic_0001>

<bundles_post_ra>
// kernel: _lambda_.7
= control target key start
LH: loop header
LB: loop body
LE: loop exit
PB: predicated region body
PF: predicated region fallthrough
CT: control target
= control target key end

     0   :  { %s564_s12 = smov 0   ;;  %s618_s0 = inlined_call_operand.vmem [shape: bf16[128,80], index: 0, kind: input, shape index: {}]   ;;  %s619_s1 = inlined_call_operand.vmem [shape: bf16[80,16], index: 1, kind: input, shape index: {}]   ;;  %s620_s2 = inlined_call_operand.vmem [shape: f32[1,16], index: 2, kind: input, shape index: {}]   ;;  %s621_s3 = inlined_call_operand.vmem [shape: bf16[128,16], index: 3, kind: output, shape index: {}]  }
   0x1 LB: > { %s441_s13 = sadd.s32 4294967295, %s542_s12   ;;  %p445_p0 = scmp.ge.s32.totalorder %s542_s12, 1  ;;  %s542_s12 = sphi %s564_s12, %s13_s12  }
   0x2   : > { %p138_p1 = scmp.lt.s32.totalorder %s542_s12, 3 }
   0x4   : > { %p139_p2 = pnand %p445_p0, %p138_p1 }
   0x5   : > { %v527_v0 = vld [vmem:[%s619_s1] sm:$0xff] (!%p139_p2)   ;;  %s446_s16 = sshll.u32 (!%p139_p2), %s441_s13, 3  ;;  %v528_v1 = vld [vmem:[%s619_s1 + $0x8] sm:$0xff] (!%p139_p2)   ;;  %v529_v2 = vld [vmem:[%s619_s1 + $0x10] sm:$0xff] (!%p139_p2)   ;;  %vm250_vm0 = vcmask (!%p139_p2), 654336   ;;  %vm376_vm1 = vcmask (!%p139_p2), 125952  }
   0x6   : > { %142 = sbr.rel (%p139_p2) target bundleno = 250 (0xfa), region = 32  ;;  %p163_p3 = scmp.lt.s32.totalorder (!%p139_p2), %s446_s16, 15  ;;  %491 = vmatprep.subr.bf16.mxu0 (!%p139_p2), %v527_v0  ;;  %509 = vmatprep.subr.bf16.mxu1 (!%p139_p2), %v527_v0  ;;  %v530_v3 = vld [vmem:[%s619_s1 + $0x18] sm:$0xff] (!%p139_p2)   ;;  %v531_v6 = vld [vmem:[%s619_s1 + $0x20] sm:$0xff] (!%p139_p2)  }
   0x7   : > { %492 = vmatpush3.bf16.msra.mxu0 (!%p139_p2), %v527_v0  ;;  %514 = vmatpush3.bf16.msra.mxu1 (!%p139_p2), %v527_v0  ;;  %v450_v9 = vld [vmem:[%s620_s2] ss:$0 sm:$0xff] (!%p139_p2) }
   0x8   : > { %493 = vmatprep.subr.bf16.mxu0 (!%p139_p2), %v528_v1  ;;  %510 = vmatprep.subr.bf16.mxu1 (!%p139_p2), %v528_v1 }
   0xb   : > { %494 = vmatpush3.bf16.msra.mxu0 (!%p139_p2), %v528_v1  ;;  %515 = vmatpush3.bf16.msra.mxu1 (!%p139_p2), %v528_v1 }
   0xc   : > { %495 = vmatprep.subr.bf16.mxu0 (!%p139_p2), %v529_v2  ;;  %511 = vmatprep.subr.bf16.mxu1 (!%p139_p2), %v529_v2 }
   0xd   : > { %s623_s16 = smov (!%p163_p3, %s446_s16), 15 }
   0xe   : > { %s447_s21 = sshll.u32 %s623_s16, 2 }
   0xf   : > { %s166_s26 = scalar_lea.vmem %s618_s0, %s447_s21  ;;  %496 = vmatpush3.bf16.msra.mxu0 %v529_v2  ;;  %516 = vmatpush3.bf16.msra.mxu1 %v529_v2  ;;  %s172_s6 = scalar_lea.vmem %s621_s3, %s447_s21 }
  0x10   : > { %v532_v4 = vld [vmem:[%s166_s26] sm:$0xff]   ;;  %v533_v5 = vld [vmem:[%s166_s26 + $0x10] sm:$0xff]   ;;  %497 = vmatprep.subr.bf16.mxu0 %v530_v3  ;;  %512 = vmatprep.subr.bf16.mxu1 %v530_v3  ;;  %v534_v7 = vld [vmem:[%s166_s26 + $0x8] sm:$0xff]  }
  0x11   : > { %501 = vmatprep.mubr.msk.bf16.mxu0 %vm250_vm0, %v532_v4  ;;  %505 = vmatprep.mubr.msk.bf16.mxu1 %vm250_vm0, %v533_v5  ;;  %v535_v8 = vld [vmem:[%s166_s26 + $0x18] sm:$0xff]  }
  0x13   : > { %498 = vmatpush3.bf16.msra.mxu0 %v530_v3  ;;  %517 = vmatpush3.bf16.msra.mxu1 %v530_v3 }
  0x14   : > { %499 = vmatprep.subr.bf16.mxu0 %v531_v6  ;;  %513 = vmatprep.subr.bf16.mxu1 %v531_v6 }
  0x17   : > { %500 = vmatpush3.bf16.msra.mxu0 %v531_v6  ;;  %518 = vmatpush3.bf16.msra.mxu1 %v531_v6 }
  0x1a   : > { %502 = vmatmul.mubr.msk.bf16.vlgmr.msra.gmra.mrb[0].mxu0 %vm250_vm0, %v534_v7  ;;  %506 = vmatmul.mubr.msk.bf16.vlgmr.msra.gmra.mrb[0].mxu1 %vm250_vm0, %v535_v8 }
  0xed   : > { %v503_v10 = vpop.f32.mrb[0].mxu0  ;;  %v507_v11 = vpop.f32.mrb[0].mxu1 }
  0xee   : > { %v306_v12 = vadd.f32 %v503_v10, %v450_v9  ;;  %v322_v13 = vadd.f32 %v507_v11, %v450_v9  ;;  %v297_v14 = vpop.f32.mrb[1].mxu0  ;;  %v313_v15 = vpop.f32.mrb[1].mxu1 }
  0xef   : > { %v298_v16 = vadd.f32 %v450_v9, %v297_v14  ;;  %v314_v17 = vadd.f32 %v450_v9, %v313_v15  ;;  %v504_v18 = vpop.f32.mrb[2].mxu0  ;;  %v508_v19 = vpop.f32.mrb[2].mxu1 }
  0xf0   : > { %v330_v20 = vmul.f32 0.01, %v306_v12  ;;  %v334_v21 = vmul.f32 0.01, %v322_v13  ;;  %v309_v22 = vadd.f32 %v504_v18, %v450_v9  ;;  %v325_v23 = vadd.f32 %v508_v19, %v450_v9  ;;  %v300_v24 = vpop.f32.mrb[3].mxu0  ;;  %v316_v25 = vpop.f32.mrb[3].mxu1 }
  0xf1   : > { %v328_v26 = vmul.f32 0.01, %v298_v16  ;;  %v332_v27 = vmul.f32 0.01, %v314_v17  ;;  %v301_v28 = vadd.f32 %v450_v9, %v300_v24  ;;  %v317_v29 = vadd.f32 %v450_v9, %v316_v25 }
  0xf2   : > { %v338_v30 = vmax.f32 %v306_v12, %v330_v20  ;;  %v342_v31 = vmax.f32 %v322_v13, %v334_v21  ;;  %v331_v32 = vmul.f32 0.01, %v309_v22  ;;  %v335_v33 = vmul.f32 0.01, %v325_v23 }
  0xf3   : > { %v336_v34 = vmax.f32 %v298_v16, %v328_v26  ;;  %v340_v35 = vmax.f32 %v314_v17, %v332_v27  ;;  %v329_v36 = vmul.f32 0.01, %v301_v28  ;;  %v333_v37 = vmul.f32 0.01, %v317_v29 }
  0xf4   : > { %v476_v38 = vpack.c.bf16 %v338_v30, %v338_v30  ;;  %v480_v39 = vpack.c.bf16 %v342_v31, %v342_v31  ;;  %v339_v40 = vmax.f32 %v309_v22, %v331_v32  ;;  %v343_v41 = vmax.f32 %v325_v23, %v335_v33 }
  0xf5   : > { %v474_v42 = vpack.c.bf16 %v336_v34, %v336_v34  ;;  %v478_v43 = vpack.c.bf16 %v340_v35, %v340_v35  ;;  %v337_v44 = vmax.f32 %v301_v28, %v329_v36  ;;  %v341_v45 = vmax.f32 %v317_v29, %v333_v37 }
  0xf6   : > { %379 = vst.msk [vmem:[%s172_s6 + $0x8] sm:$0xf] %vm376_vm1, %v476_v38  ;;  %383 = vst.msk [vmem:[%s172_s6 + $0x18] sm:$0xf] %vm376_vm1, %v480_v39  ;;  %v477_v46 = vpack.c.bf16 %v339_v40, %v339_v40  ;;  %v481_v47 = vpack.c.bf16 %v343_v41, %v343_v41 }
  0xf7   : > { %377 = vst.msk [vmem:[%s172_s6] sm:$0xf] %vm376_vm1, %v474_v42  ;;  %381 = vst.msk [vmem:[%s172_s6 + $0x10] sm:$0xf] %vm376_vm1, %v478_v43  ;;  %v475_v48 = vpack.c.bf16 %v337_v44, %v337_v44  ;;  %v479_v49 = vpack.c.bf16 %v341_v45, %v341_v45 }
  0xf8   : > { %380 = vst.msk [vmem:[%s172_s6 + $0xc] sm:$0xf] %vm376_vm1, %v477_v46  ;;  %384 = vst.msk [vmem:[%s172_s6 + $0x1c] sm:$0xf] %vm376_vm1, %v481_v47 }
  0xf9   : > { %378 = vst.msk [vmem:[%s172_s6 + $0x4] sm:$0xf] %vm376_vm1, %v475_v48  ;;  %382 = vst.msk [vmem:[%s172_s6 + $0x14] sm:$0xf] %vm376_vm1, %v479_v49 }
  0xfa PF: > { %s13_s12 = sadd.s32 1, %s542_s12  }
  0xfb   : > { %p10_p4 = scmp.ge.s32.totalorder %s13_s12, 4  }
  0xfd   :  { %12 = sbr.rel (!%p10_p4) target bundleno = 1 (0x1), region = 62 }

// kernel: _lambda_.8
= control target key start
LH: loop header
LB: loop body
LE: loop exit
PB: predicated region body
PF: predicated region fallthrough
CT: control target
= control target key end

     0   :  { %s1020_s18 = smov 0   ;;  %s1237_s0 = inlined_call_operand.vmem [shape: bf16[32,400], index: 0, kind: input, shape index: {}]   ;;  %s1238_s1 = inlined_call_operand.vmem [shape: bf16[400,128], index: 1, kind: input, shape index: {}]   ;;  %s1239_s2 = inlined_call_operand.vmem [shape: bf16[16,4], index: 2, kind: input, shape index: {}]   ;;  %s1240_s3 = inlined_call_operand.vmem [shape: f32[1,4], index: 3, kind: input, shape index: {}]   ;;  %s1241_s4 = inlined_call_operand.vmem [shape: f32[1,32], index: 4, kind: input, shape index: {}]   ;;  %s1242_s5 = inlined_call_operand.vmem [shape: bf16[32,32], index: 5, kind: output, shape index: {}]  }
   0x1 LB: > { %s823_s19 = sadd.s32 4294967295, %s973_s18   ;;  %p827_p0 = scmp.ge.s32.totalorder %s973_s18, 1  ;;  %s973_s18 = sphi %s1020_s18, %s15_s18  }
   0x2   : > { %p189_p1 = scmp.lt.s32.totalorder %s973_s18, 3 }
   0x4   : > { %p190_p2 = pnand %p827_p0, %p189_p1 }
   0x5   : > { %s828_s20 = sshll.u32 (!%p190_p2), %s823_s19, 1  ;;  %v938_v0 = vld [vmem:[%s1239_s2] sm:$0xff] (!%p190_p2)   ;;  %v975_v1 = vmov (!%p190_p2), 0.0   ;;  %vm976_vm0 = vmmov (!%p190_p2), 0   ;;  %s977_s27 = smov (!%p190_p2), 64   ;;  %vm258_vm1 = vcmask (!%p190_p2), 130048  }
   0x6   : > { %193 = sbr.rel (%p190_p2) target bundleno = 997 (0x3e5), region = 40  ;;  %p219_p3 = scmp.lt.s32.totalorder (!%p190_p2), %s828_s20, 3  ;;  %898 = vmatprep.subr.bf16.mxu1 (!%p190_p2), %v975_v1  ;;  %900 = vmatprep.mubr.msk.bf16.mxu1 (!%p190_p2), %vm976_vm0, %v975_v1  ;;  %v833_v4 = vld [vmem:[%s1240_s3] ss:$0 sm:$0xff] (!%p190_p2)  ;;  %vm303_vm2 = vcmask (!%p190_p2), 31744   ;;  %v978_v15 = vmov (!%p190_p2), 0  }
   0x7   : > { %899 = vmatpush3.bf16.msra.mxu1 (!%p190_p2), %v938_v0  ;;  %v939_v13 = vld [vmem:[%s1238_s1 + $0x40] sm:$0xff] (!%p190_p2)   ;;  %568 = vmatprep.subr.bf16.mxu0 (!%p190_p2), %v978_v15  ;;  %v942_v17 = vld [vmem:[%s1238_s1 + $0x48] sm:$0xff] (!%p190_p2)   ;;  %v945_v20 = vld [vmem:[%s1238_s1 + $0x50] sm:$0xff] (!%p190_p2)   ;;  %v979_v42 = vmov (!%p190_p2), 1   ;;  %vm981_vm5 = vmmov (!%p190_p2), 1   ;;  %s982_s13 = smov (!%p190_p2), 1  }
   0x8   : > { %v940_v14 = vld [vmem:[%s1238_s1 + $0x80] sm:$0xff] (!%p190_p2)   ;;  %876 = vmatprep.subr.bf16.mxu1 (!%p190_p2), %v939_v13  ;;  %v943_v18 = vld [vmem:[%s1238_s1 + $0x88] sm:$0xff] (!%p190_p2)   ;;  %v946_v21 = vld [vmem:[%s1238_s1 + $0x90] sm:$0xff] (!%p190_p2)   ;;  %928 = vset.pattern.permute.xlu0 (!%p190_p2), %v979_v42  ;;  %s983_s14 = smov (!%p190_p2), 126   ;;  %s984_s15 = smov (!%p190_p2), 2   ;;  %v987_v13 = vmov (!%p190_p2), 2  }
   0x9   : > { %v941_v16 = vld [vmem:[%s1238_s1] sm:$0xff] (!%p190_p2)   ;;  %569 = vmatpush1.bf16.msra.mxu0 (!%p190_p2), %v940_v14  ;;  %v944_v19 = vld [vmem:[%s1238_s1 + $0x8] sm:$0xff] (!%p190_p2)   ;;  %v947_v22 = vld [vmem:[%s1238_s1 + $0x10] sm:$0xff] (!%p190_p2)   ;;  %927 = vset.pattern.permute.xlu1 (!%p190_p2), %v979_v42  ;;  %s985_s16 = smov (!%p190_p2), 3   ;;  %s988_s17 = smov (!%p190_p2), 96  }
   0xa   : > { %570 = vmatprep.subr.bf16.mxu0 (!%p190_p2), %v978_v15  ;;  %v948_v23 = vld [vmem:[%s1238_s1 + $0x58] sm:$0xff] (!%p190_p2)   ;;  %v951_v26 = vld [vmem:[%s1238_s1 + $0x60] sm:$0xff] (!%p190_p2)   ;;  %v954_v29 = vld [vmem:[%s1238_s1 + $0x68] sm:$0xff] (!%p190_p2)   ;;  %s989_s19 = smov (!%p190_p2), 32  }
   0xb   : > { %v949_v24 = vld [vmem:[%s1238_s1 + $0x98] sm:$0xff] (!%p190_p2)   ;;  %v952_v27 = vld [vmem:[%s1238_s1 + $0xa0] sm:$0xff] (!%p190_p2)   ;;  %v955_v30 = vld [vmem:[%s1238_s1 + $0xa8] sm:$0xff] (!%p190_p2)  }
   0xc   : > { %v950_v25 = vld [vmem:[%s1238_s1 + $0x18] sm:$0xff] (!%p190_p2)   ;;  %v953_v28 = vld [vmem:[%s1238_s1 + $0x20] sm:$0xff] (!%p190_p2)   ;;  %v956_v31 = vld [vmem:[%s1238_s1 + $0x28] sm:$0xff] (!%p190_p2)  }
   0xd   : > { %s1250_s20 = smov (!%p219_p3, %s828_s20), 3  ;;  %571 = vmatpush1.bf16.msra.mxu0 %v943_v18  ;;  %v957_v32 = vld [vmem:[%s1238_s1 + $0x70] sm:$0xff]   ;;  %v960_v36 = vld [vmem:[%s1238_s1 + $0x78] sm:$0xff]   ;;  %v963_v40 = vld [vmem:[%s1238_s1 + $0xc0] sm:$0xff]  }
   0xe   : > { %s871_s23 = sshll.u32 %s1250_s20, 4  ;;  %572 = vmatprep.subr.bf16.mxu0 %v978_v15  ;;  %v958_v33 = vld [vmem:[%s1238_s1 + $0xb0] sm:$0xff]   ;;  %v961_v37 = vld [vmem:[%s1238_s1 + $0xb8] sm:$0xff]   ;;  %v866_v42 = vld [vmem:[%s1241_s4] ss:$0 sm:$0xff] }
   0xf   : > { %s1037_s26 = scalar_lea.vmem %s1237_s0, %s871_s23  ;;  %v959_v35 = vld [vmem:[%s1238_s1 + $0x30] sm:$0xff]   ;;  %v962_v38 = vld [vmem:[%s1238_s1 + $0x38] sm:$0xff]  }
  0x10   : > { %v935_v2 = vld [vmem:[%s1037_s26 + $0x4] ss:$16 sps:$4 sm:$0xff]   ;;  %v966_v34 = vld [vmem:[%s1037_s26 + $0xc] ss:$16 sps:$4 sm:$0xff]   ;;  %v937_v39 = vld [vmem:[%s1037_s26] ss:$16 sps:$4 sm:$0xff]  }
  0x11   : > { %250 = vrot.lane.b32.xlu0 %v935_v2, %s977_s27  ;;  %573 = vmatpush1.bf16.msra.mxu0 %v946_v21  ;;  %v964_v41 = vld [vmem:[%s1037_s26 + $0x8] ss:$16 sps:$4 sm:$0xff]   ;;  %s980_s26 = smov 127  }
  0x12   : > { %574 = vmatprep.subr.bf16.mxu0 %v978_v15  ;;  %865 = vmatprep.mubr.msk.bf16.mxu0 %vm258_vm1, %v966_v34 }
  0x15   : > { %575 = vmatpush1.bf16.msra.mxu0 %v949_v24 }
  0x16   : > { %576 = vmatprep.subr.bf16.mxu0 %v978_v15 }
  0x19   : > { %577 = vmatpush1.bf16.msra.mxu0 %v952_v27 }
  0x1a   : > { %578 = vmatprep.subr.bf16.mxu0 %v978_v15 }
  0x1d   : > { %579 = vmatpush1.bf16.msra.mxu0 %v955_v30 }
  0x1e   : > { %580 = vmatprep.subr.bf16.mxu0 %v978_v15 }
  0x21   : > { %581 = vmatpush1.bf16.msra.mxu0 %v958_v33 }
  0x22   : > { %582 = vmatprep.subr.bf16.mxu0 %v978_v15 }
  0x25   : > { %583 = vmatpush1.bf16.msra.mxu0 %v961_v37 }
  0x26   : > { %584 = vmatprep.subr.bf16.mxu0 %v978_v15 }
  0x29   : > { %585 = vmatpush1.bf16.msra.mxu0 %v963_v40 }
  0x2c   : > { %601 = vmatmul.mubr.bf16.vlgmr.msra.gmra.mrb[0].mxu0 %v964_v41 }
  0x83   : > { %v251_v3 = vpop.permute.xlu0 %250 }
  0x84   : > { %901 = vmatmul.mubr.msk.bf16.vlgmr.msra.gmra.mrb[0].mxu1 %vm258_vm1, %v251_v3 }
  0x85   : > { %559 = vmatprep.mubr.bf16.mxu1 %v935_v2  ;;  %877 = vmatpush3.bf16.msra.mxu1 %v941_v16 }
  0x86   : > { %878 = vmatprep.subr.bf16.mxu1 %v942_v17 }
  0x89   : > { %879 = vmatpush3.bf16.msra.mxu1 %v944_v19 }
  0x8a   : > { %880 = vmatprep.subr.bf16.mxu1 %v945_v20 }
  0x8d   : > { %881 = vmatpush3.bf16.msra.mxu1 %v947_v22 }
  0x8e   : > { %882 = vmatprep.subr.bf16.mxu1 %v948_v23 }
  0x91   : > { %883 = vmatpush3.bf16.msra.mxu1 %v950_v25 }
  0x92   : > { %884 = vmatprep.subr.bf16.mxu1 %v951_v26 }
  0x95   : > { %885 = vmatpush3.bf16.msra.mxu1 %v953_v28 }
  0x96   : > { %886 = vmatprep.subr.bf16.mxu1 %v954_v29 }
  0x99   : > { %887 = vmatpush3.bf16.msra.mxu1 %v956_v31 }
  0x9a   : > { %888 = vmatprep.subr.bf16.mxu1 %v957_v32 }
  0x9d   : > { %889 = vmatpush3.bf16.msra.mxu1 %v959_v35 }
  0x9e   : > { %890 = vmatprep.subr.bf16.mxu1 %v960_v36 }
  0xa1   : > { %891 = vmatpush3.bf16.msra.mxu1 %v962_v38 }
  0xa4   : > { %560 = vmatmul.mubr.bf16.vlgmr.msra.gmra.mrb[4].mxu1 %v937_v39 }
  0xff   : > { %v602_v58 = vpop.f32.mrb[0].mxu0 }
 0x100   : > { %v604_v0 = vpop.f32.mrb[1].mxu0 }
 0x101   : > { %v605_v2 = vpop.f32.mrb[2].mxu0 }
 0x157   : > { %v296_v5 = vpop.f32.mrb[0].mxu1 }
 0x158   : > { %v1045_v6 = vadd.f32 %v833_v4, %v296_v5  ;;  %v902_v7 = vpop.f32.mrb[1].mxu1 }
 0x159   : > { %v299_v8 = vpop.f32.mrb[2].mxu1  ;;  %v986_v7 = vmov 3  }
 0x15a   : > { %v1047_v9 = vadd.f32 %v833_v4, %v299_v8  ;;  %v903_v10 = vpop.f32.mrb[3].mxu1  ;;  %v304_v11 = vsel %vm303_vm2, %v1045_v6, -inf  ;;  %v607_v4 = vpop.f32.mrb[3].mxu0 }
 0x15b   : > { %305 = vmax.xlane.f32.xlu0 %v304_v11 }
 0x15c   : > { %v307_v12 = vsel %vm303_vm2, %v1047_v9, -inf }
 0x15d   : > { %308 = vmax.xlane.f32.xlu1 %v307_v12 }
 0x177   : > { %v892_v52 = vpop.f32.mrb[4].mxu1 }
 0x178   : > { %v893_v53 = vpop.f32.mrb[5].mxu1 }
 0x179   : > { %v894_v55 = vadd.f32 %v893_v53, %v892_v52  ;;  %v895_v56 = vpop.f32.mrb[6].mxu1 }
 0x17a   : > { %v896_v62 = vpop.f32.mrb[7].mxu1 }
 0x17b   : > { %v1181_v61 = vadd.f32 %v894_v55, %v602_v58  ;;  %v897_v63 = vadd.f32 %v896_v62, %v895_v56 }
 0x17d   : > { %v1189_v3 = vadd.f32 %v897_v63, %v605_v2 }
 0x1e8   : > { %v306_v43 = vpop.xlane.xlu0 %305 }
 0x1e9   : > { %vm1140_vm3 = vcmp.ge.f32.partialorder %v1045_v6, %v306_v43 }
 0x1ea   : > { %v309_v45 = vpop.xlane.xlu1 %308  ;;  %v1147_v46 = vsel %vm1140_vm3, 1, %v978_v15  ;;  %vm625_vm7 = vmxor %vm1140_vm3, %vm981_vm5 }
 0x1eb   : > { %vm1150_vm4 = vcmp.ge.f32.partialorder %v1047_v9, %v309_v45  ;;  %659 = vrot.lane.b32.xlu1 %v1147_v46, %s980_s26  ;;  %v627_v50 = vsel %vm625_vm7, 1, %v978_v15 }
 0x1ec   : > { %vm626_vm6 = vmxor %vm1150_vm4, %vm981_vm5  ;;  %v1163_v49 = vsel %vm1150_vm4, 1, %v978_v15 }
 0x1ed   : > { %v628_v48 = vsel %vm626_vm6, 1, %v978_v15 }
 0x1ee   : > { %631 = vrot.lane.b32.xlu0 %v628_v48, %s982_s13 }
 0x1ef   : > { %701 = vrot.lane.b32.xlu1 %v1147_v46, %s983_s14 }
 0x1f3   : > { %661 = vrot.lane.b32.xlu1 %v1163_v49, %s980_s26 }
 0x1f7   : > { %703 = vrot.lane.b32.xlu1 %v1163_v49, %s983_s14 }
 0x1fb   : > { %629 = vrot.lane.b32.xlu1 %v627_v50, %s982_s13 }
 0x25d   : > { %v660_v51 = vpop.permute.xlu1 %659 }
 0x25e   : > { %vm663_vm8 = vcmp.ne.s32.totalorder %v660_v51, 0 }
 0x25f   : > { %vm1173_vm9 = vmor %vm1140_vm3, %vm663_vm8 }
 0x260   : > { %vm667_vm10 = vmxor %vm1173_vm9, %vm981_vm5  ;;  %v632_v57 = vpop.permute.xlu0 %631 }
 0x261   : > { %vm634_vm11 = vcmp.ne.s32.totalorder %v632_v57, 0  ;;  %v702_v59 = vpop.permute.xlu1 %701  ;;  %v669_v60 = vsel %vm667_vm10, 1, %v978_v15 }
 0x262   : > { %vm636_vm12 = vmand %vm1150_vm4, %vm634_vm11  ;;  %vm705_vm13 = vcmp.ne.s32.totalorder %v702_v59, 0  ;;  %671 = vrot.lane.b32.xlu1 %v669_v60, %s984_s15 }
 0x263   : > { %vm707_vm14 = vmor %vm1173_vm9, %vm705_vm13  ;;  %v638_v1 = vsel %vm636_vm12, 1, %v978_v15 }
 0x264   : > { %vm709_vm15 = vmxor %vm707_vm14, %vm981_vm5  ;;  %643 = vperm.xlu0 %928, %v638_v1  }
 0x265   : > { %v662_v5 = vpop.permute.xlu1 %661  ;;  %v711_v6 = vsel %vm709_vm15, 1, %v978_v15 }
 0x266   : > { %vm664_vm0 = vcmp.ne.s32.totalorder %v662_v5, 0  ;;  %713 = vrot.lane.b32.xlu1 %v711_v6, %s985_s16 }
 0x267   : > { %vm666_vm1 = vmor %vm1150_vm4, %vm664_vm0 }
 0x268   : > { %vm668_vm2 = vmxor %vm666_vm1, %vm981_vm5  ;;  %930 = vset.pattern.permute.xlu0 %v986_v7 }
 0x269   : > { %v704_v8 = vpop.permute.xlu1 %703  ;;  %v670_v9 = vsel %vm668_vm2, 1, %v978_v15 }
 0x26a   : > { %vm706_vm6 = vcmp.ne.s32.totalorder %v704_v8, 0  ;;  %673 = vrot.lane.b32.xlu1 %v670_v9, %s984_s15 }
 0x26b   : > { %vm708_vm7 = vmor %vm666_vm1, %vm706_vm6 }
 0x26c   : > { %vm710_vm8 = vmxor %vm708_vm7, %vm981_vm5 }
 0x26d   : > { %v630_v10 = vpop.permute.xlu1 %629  ;;  %v712_v11 = vsel %vm710_vm8, 1, %v978_v15 }
 0x26e   : > { %vm633_vm9 = vcmp.ne.s32.totalorder %v630_v10, 0  ;;  %715 = vrot.lane.b32.xlu1 %v712_v11, %s985_s16 }
 0x26f   : > { %vm635_vm10 = vmand %vm1140_vm3, %vm633_vm9 }
 0x270   : > { %v637_v12 = vsel %vm635_vm10, 1, %v978_v15 }
 0x272   : > { %640 = vperm.xlu1 %927, %v637_v12  }
 0x276   : > { %929 = vset.pattern.permute.xlu1 %v987_v13 }
 0x2d4   : > { %v672_v14 = vpop.permute.xlu1 %671 }
 0x2d5   : > { %vm675_vm11 = vcmp.ne.s32.totalorder %v672_v14, 0 }
 0x2d6   : > { %vm677_vm12 = vmand %vm1140_vm3, %vm675_vm11  ;;  %vm764_vm11 = vcmask 257024  }
 0x2d7   : > { %v679_v16 = vsel %vm677_vm12, 1, %v978_v15 }
 0x2d8   : > { %682 = vperm.xlu1 %929, %v679_v16   ;;  %v714_v17 = vpop.permute.xlu1 %713 }
 0x2d9   : > { %vm717_vm5 = vcmp.ne.s32.totalorder %v714_v17, 0 }
 0x2da   : > { %vm719_vm13 = vmand %vm1140_vm3, %vm717_vm5 }
 0x2db   : > { %v721_v18 = vsel %vm719_vm13, 1, %v978_v15 }
 0x2dc   : > { %724 = vperm.xlu0 %930, %v721_v18   ;;  %v674_v19 = vpop.permute.xlu1 %673 }
 0x2dd   : > { %vm676_vm14 = vcmp.ne.s32.totalorder %v674_v19, 0 }
 0x2de   : > { %vm678_vm15 = vmand %vm1150_vm4, %vm676_vm14 }
 0x2df   : > { %v680_v20 = vsel %vm678_vm15, 1, %v978_v15 }
 0x2e0   : > { %933 = vset.pattern.permute.xlu0 %v978_v15  ;;  %685 = vperm.xlu1 %929, %v680_v20   ;;  %v716_v21 = vpop.permute.xlu1 %715 }
 0x2e1   : > { %vm718_vm0 = vcmp.ne.s32.totalorder %v716_v21, 0  ;;  %617 = vperm.xlu0 %933, %v1163_v49  }
 0x2e2   : > { %vm720_vm3 = vmand %vm1150_vm4, %vm718_vm0 }
 0x2e3   : > { %v722_v22 = vsel %vm720_vm3, 1, %v978_v15  ;;  %v644_v23 = vpop.permute.xlu0 %643 }
 0x2e4   : > { %931 = vset.pattern.permute.xlu1 %v986_v7  ;;  %vm646_vm2 = vcmp.eq.s32.totalorder %v644_v23, 1 }
 0x2e5   : > { %727 = vperm.xlu1 %931, %v722_v22   ;;  %934 = vset.pattern.permute.xlu0 %v986_v7  ;;  %v648_v26 = vsel %vm646_vm2, %v1189_v3, 0.0 }
 0x2e9   : > { %932 = vset.pattern.permute.xlu1 %v978_v15 }
 0x2ea   : > { %614 = vperm.xlu1 %932, %v1147_v46  }
 0x2f1   : > { %v641_v24 = vpop.permute.xlu1 %640 }
 0x2f2   : > { %vm645_vm1 = vcmp.eq.s32.totalorder %v641_v24, 1 }
 0x2f3   : > { %v647_v25 = vsel %vm645_vm1, %v1181_v61, 0.0 }
 0x2f4   : > { %651 = vrot.lane.b32.xlu1 %v647_v25, %s988_s17 }
 0x2f8   : > { %653 = vrot.lane.b32.xlu1 %v648_v26, %s988_s17 }
 0x357   : > { %v683_v27 = vpop.permute.xlu1 %682 }
 0x358   : > { %vm687_vm4 = vcmp.eq.s32.totalorder %v683_v27, 1 }
 0x359   : > { %v689_v28 = vsel %vm687_vm4, %v1181_v61, 0.0 }
 0x35a   : > { %693 = vrot.lane.b32.xlu0 %v689_v28, %s977_s27 }
 0x35b   : > { %v725_v15 = vpop.permute.xlu0 %724 }
 0x35c   : > { %vm729_vm6 = vcmp.eq.s32.totalorder %v725_v15, 1 }
 0x35d   : > { %v731_v29 = vsel %vm729_vm6, %v1181_v61, 0.0 }
 0x35e   : > { %735 = vrot.lane.b32.xlu0 %v731_v29, %s989_s19 }
 0x35f   : > { %v686_v30 = vpop.permute.xlu1 %685 }
 0x360   : > { %vm688_vm7 = vcmp.eq.s32.totalorder %v686_v30, 1  ;;  %v618_v35 = vpop.permute.xlu0 %617 }
 0x361   : > { %v690_v31 = vsel %vm688_vm7, %v1189_v3, 0.0  ;;  %vm620_vm10 = vcmp.eq.s32.totalorder %v618_v35, 1 }
 0x362   : > { %695 = vrot.lane.b32.xlu1 %v690_v31, %s977_s27  ;;  %s832_s27 = sshll.u32 %s1250_s20, 2  ;;  %v622_v47 = vsel %vm620_vm10, %v1189_v3, 0.0 }
 0x363   : > { %s229_s25 = scalar_lea.vmem %s1242_s5, %s832_s27 }
 0x364   : > { %v728_v32 = vpop.permute.xlu1 %727 }
 0x365   : > { %vm730_vm8 = vcmp.eq.s32.totalorder %v728_v32, 1 }
 0x366   : > { %v732_v33 = vsel %vm730_vm8, %v1189_v3, 0.0 }
 0x367   : > { %737 = vrot.lane.b32.xlu1 %v732_v33, %s989_s19 }
 0x369   : > { %v615_v34 = vpop.permute.xlu1 %614 }
 0x36a   : > { %vm619_vm9 = vcmp.eq.s32.totalorder %v615_v34, 1 }
 0x36b   : > { %v621_v37 = vsel %vm619_vm9, %v1181_v61, 0.0 }
 0x36d   : > { %v652_v36 = vpop.permute.xlu1 %651 }
 0x36e   : > { %v657_v39 = vadd.f32 %v652_v36, %v621_v37 }
 0x371   : > { %v654_v41 = vpop.permute.xlu1 %653 }
 0x372   : > { %v658_v49 = vadd.f32 %v654_v41, %v622_v47 }
 0x3cc   : > { %v694_v38 = vpop.permute.xlu0 %693 }
 0x3cd   : > { %v699_v40 = vadd.f32 %v694_v38, %v657_v39 }
 0x3d0   : > { %v736_v43 = vpop.permute.xlu0 %735 }
 0x3d1   : > { %v741_v44 = vadd.f32 %v736_v43, %v699_v40 }
 0x3d3   : > { %v750_v45 = vadd.f32 %v866_v42, %v741_v44 }
 0x3d4   : > { %v696_v46 = vpop.permute.xlu1 %695 }
 0x3d5   : > { %v752_v48 = vmul.f32 0.01, %v750_v45  ;;  %v700_v51 = vadd.f32 %v696_v46, %v658_v49 }
 0x3d7   : > { %v754_v50 = vmax.f32 %v750_v45, %v752_v48 }
 0x3d9   : > { %v872_v52 = vpack.c.bf16 %v754_v50, %v754_v50  ;;  %v738_v53 = vpop.permute.xlu1 %737 }
 0x3da   : > { %v742_v54 = vadd.f32 %v738_v53, %v700_v51 }
 0x3db   : > { %765 = vst.msk [vmem:[%s229_s25] sm:$0xf] %vm764_vm11, %v872_v52 }
 0x3dc   : > { %v751_v55 = vadd.f32 %v866_v42, %v742_v54 }
 0x3de   : > { %v753_v56 = vmul.f32 0.01, %v751_v55 }
 0x3e0   : > { %v755_v57 = vmax.f32 %v751_v55, %v753_v56 }
 0x3e2   : > { %v873_v58 = vpack.c.bf16 %v755_v57, %v755_v57 }
 0x3e4   : > { %766 = vst.msk [vmem:[%s229_s25 + $0x4] sm:$0xf] %vm764_vm11, %v873_v58 }
 0x3e5 PF: > { %s15_s18 = sadd.s32 1, %s973_s18  }
 0x3e6   : > { %p12_p4 = scmp.ge.s32.totalorder %s15_s18, 4  }
 0x3e8   :  { %14 = sbr.rel (!%p12_p4) target bundleno = 1 (0x1), region = 70 }

// kernel: _lambda_.11
= control target key start
LH: loop header
LB: loop body
LE: loop exit
PB: predicated region body
PF: predicated region fallthrough
CT: control target
= control target key end

     0   :  { %s439_s15 = smov 0   ;;  %s465_s0 = inlined_call_operand.vmem [shape: bf16[32,8], index: 0, kind: input, shape index: {}]   ;;  %s466_s1 = inlined_call_operand.vmem [shape: bf16[8,32], index: 1, kind: input, shape index: {}]   ;;  %s467_s2 = inlined_call_operand.vmem [shape: f32[1,32], index: 2, kind: input, shape index: {}]   ;;  %s468_s3 = inlined_call_operand.vmem [shape: bf16[32,32], index: 3, kind: input, shape index: {}]   ;;  %s469_s4 = inlined_call_operand.vmem [shape: f32[32,32], index: 4, kind: output, shape index: {}]  }
   0x1 LB: > { %s365_s16 = sadd.s32 4294967295, %s410_s15   ;;  %p369_p0 = scmp.ge.s32.totalorder %s410_s15, 1  ;;  %s410_s15 = sphi %s439_s15, %s14_s15  }
   0x2   : > { %p174_p1 = scmp.lt.s32.totalorder %s410_s15, 3 }
   0x4   : > { %p175_p2 = pnand %p369_p0, %p174_p1 }
   0x5   : > { %v226_v0 = vld [vmem:[%s466_s1] sm:$0xf] (!%p175_p2)  ;;  %vm243_vm0 = vcmask (!%p175_p2), 1043456   ;;  %s370_s19 = sshll.u32 (!%p175_p2), %s365_s16, 1  ;;  %v412_v1 = vmov (!%p175_p2), 0.0   ;;  %vm413_vm1 = vmmov (!%p175_p2), 0  }
   0x6   : > { %178 = sbr.rel (%p175_p2) target bundleno = 236 (0xec), region = 36  ;;  %387 = vmatprep.subr.bf16.mxu0 (!%p175_p2), %v412_v1  ;;  %v245_v2 = vsel (!%p175_p2), %vm243_vm0, %v226_v0, 0  ;;  %389 = vmatprep.mubr.msk.bf16.mxu0 (!%p175_p2), %vm413_vm1, %v412_v1  ;;  %p206_p3 = scmp.lt.s32.totalorder (!%p175_p2), %s370_s19, 3  ;;  %vm239_vm2 = vcmask (!%p175_p2), 64512   ;;  %v376_v5 = vld [vmem:[%s467_s2] ss:$0 sm:$0xff] (!%p175_p2) }
   0x7   : > { %388 = vmatpush3.bf16.msra.mxu0 (!%p175_p2), %v245_v2  ;;  %vm294_vm3 = vcmask (!%p175_p2), 261120  }
   0xd   : > { %s471_s19 = smov (!%p206_p3, %s370_s19), 3 }
   0xe   : > { %s371_s20 = sshll.u32 %s471_s19, 2  ;;  %s375_s29 = sshll.u32 %s471_s19, 3 }
   0xf   : > { %s209_s23 = scalar_lea.vmem %s465_s0, %s371_s20  ;;  %s215_s26 = scalar_lea.vmem %s468_s3, %s371_s20 }
  0x10   : > { %v403_v3 = vld [vmem:[%s209_s23] sm:$0xff]   ;;  %s221_s6 = scalar_lea.vmem %s469_s4, %s375_s29 }
  0x11   : > { %390 = vmatmul.mubr.msk.bf16.vlgmr.msra.gmra.mrb[0].mxu0 %vm239_vm2, %v403_v3  ;;  %v382_v4 = vld [vmem:[%s215_s26] sm:$0xff]  }
  0x12   : > { %v383_v6 = vunpack.c.l.bf16 %v382_v4  ;;  %v384_v10 = vunpack.c.h.bf16 %v382_v4 }
  0xe4   : > { %v281_v7 = vpop.f32.mrb[0].mxu0 }
  0xe5   : > { %v282_v8 = vadd.f32 %v376_v5, %v281_v7  ;;  %v391_v9 = vpop.f32.mrb[1].mxu0 }
  0xe6   : > { %v284_v11 = vpop.f32.mrb[2].mxu0 }
  0xe7   : > { %v292_v12 = vadd.f32 %v383_v6, %v282_v8  ;;  %v285_v13 = vadd.f32 %v376_v5, %v284_v11  ;;  %v392_v14 = vpop.f32.mrb[3].mxu0 }
  0xe9   : > { %295 = vst.msk [vmem:[%s221_s6] sm:$0xff] %vm294_vm3, %v292_v12  ;;  %v293_v15 = vadd.f32 %v384_v10, %v285_v13 }
  0xeb   : > { %296 = vst.msk [vmem:[%s221_s6 + $0x8] sm:$0xff] %vm294_vm3, %v293_v15 }
  0xec PF: > { %s14_s15 = sadd.s32 1, %s410_s15  }
  0xed   : > { %p11_p4 = scmp.ge.s32.totalorder %s14_s15, 4  }
  0xef   :  { %13 = sbr.rel (!%p11_p4) target bundleno = 1 (0x1), region = 69 }

// kernel: _lambda_.10
= control target key start
LH: loop header
LB: loop body
LE: loop exit
PB: predicated region body
PF: predicated region fallthrough
CT: control target
= control target key end

     0   :  { %s637_s12 = smov 0   ;;  %s715_s0 = inlined_call_operand.vmem [shape: bf16[32,288], index: 0, kind: input, shape index: {}]   ;;  %s716_s1 = inlined_call_operand.vmem [shape: bf16[288,8], index: 1, kind: input, shape index: {}]   ;;  %s717_s2 = inlined_call_operand.vmem [shape: f32[1,8], index: 2, kind: input, shape index: {}]   ;;  %s718_s3 = inlined_call_operand.vmem [shape: bf16[32,8], index: 3, kind: output, shape index: {}]  }
   0x1 LB: > { %s503_s13 = sadd.s32 4294967295, %s613_s12   ;;  %p507_p0 = scmp.ge.s32.totalorder %s613_s12, 1  ;;  %s613_s12 = sphi %s637_s12, %s13_s12  }
   0x2   : > { %p139_p1 = scmp.lt.s32.totalorder %s613_s12, 3 }
   0x4   : > { %p140_p2 = pnand %p507_p0, %p139_p1 }
   0x5   : > { %v585_v0 = vld [vmem:[%s716_s1 + $0x40] sm:$0xff] (!%p140_p2)   ;;  %v615_v2 = vmov (!%p140_p2), 0.0   ;;  %s508_s18 = sshll.u32 (!%p140_p2), %s503_s13, 1  ;;  %v587_v3 = vld [vmem:[%s716_s1 + $0x48] sm:$0xff] (!%p140_p2)   ;;  %v589_v5 = vld [vmem:[%s716_s1 + $0x50] sm:$0xff] (!%p140_p2)   ;;  %vm616_vm0 = vmmov (!%p140_p2), 0  }
   0x6   : > { %143 = sbr.rel (%p140_p2) target bundleno = 264 (0x108), region = 32  ;;  %v586_v1 = vld [vmem:[%s716_s1] sm:$0xff] (!%p140_p2)   ;;  %566 = vmatprep.subr.bf16.mxu1 (!%p140_p2), %v615_v2  ;;  %541 = vmatprep.subr.bf16.mxu0 (!%p140_p2), %v585_v0  ;;  %p165_p3 = scmp.lt.s32.totalorder (!%p140_p2), %s508_s18, 3  ;;  %v588_v4 = vld [vmem:[%s716_s1 + $0x8] sm:$0xff] (!%p140_p2)   ;;  %v590_v6 = vld [vmem:[%s716_s1 + $0x10] sm:$0xff] (!%p140_p2)   ;;  %vm348_vm1 = vcmask (!%p140_p2), 261120  }
   0x7   : > { %542 = vmatpush3.bf16.msra.mxu0 (!%p140_p2), %v586_v1  ;;  %570 = vmatprep.mubr.msk.bf16.mxu1 (!%p140_p2), %vm616_vm0, %v615_v2  ;;  %v591_v7 = vld [vmem:[%s716_s1 + $0x58] sm:$0xff] (!%p140_p2)   ;;  %v593_v9 = vld [vmem:[%s716_s1 + $0x60] sm:$0xff] (!%p140_p2)   ;;  %v595_v12 = vld [vmem:[%s716_s1 + $0x68] sm:$0xff] (!%p140_p2)   ;;  %vm444_vm2 = vcmask (!%p140_p2), 60416  }
   0x8   : > { %543 = vmatprep.subr.bf16.mxu0 (!%p140_p2), %v587_v3  ;;  %v592_v8 = vld [vmem:[%s716_s1 + $0x18] sm:$0xff] (!%p140_p2)   ;;  %v599_v10 = vld [vmem:[%s716_s1 + $0x80] sm:$0xff] (!%p140_p2)   ;;  %v596_v13 = vld [vmem:[%s716_s1 + $0x28] sm:$0xff] (!%p140_p2)  }
   0x9   : > { %v594_v11 = vld [vmem:[%s716_s1 + $0x20] sm:$0xff] (!%p140_p2)   ;;  %567 = vmatpush3.bf16.msra.mxu1 (!%p140_p2), %v599_v10  ;;  %v605_v15 = vld [vmem:[%s716_s1 + $0x88] sm:$0xff] (!%p140_p2)   ;;  %v597_v16 = vld [vmem:[%s716_s1 + $0x70] sm:$0xff] (!%p140_p2)  }
   0xa   : > { %568 = vmatprep.subr.bf16.mxu1 (!%p140_p2), %v615_v2  ;;  %v598_v18 = vld [vmem:[%s716_s1 + $0x30] sm:$0xff] (!%p140_p2)   ;;  %v600_v19 = vld [vmem:[%s716_s1 + $0x78] sm:$0xff] (!%p140_p2)   ;;  %v512_v28 = vld [vmem:[%s717_s2] ss:$0 sm:$0xff] (!%p140_p2) }
   0xb   : > { %544 = vmatpush3.bf16.msra.mxu0 (!%p140_p2), %v588_v4  ;;  %v601_v20 = vld [vmem:[%s716_s1 + $0x38] sm:$0xff] (!%p140_p2)  }
   0xc   : > { %545 = vmatprep.subr.bf16.mxu0 (!%p140_p2), %v589_v5 }
   0xd   : > { %s720_s18 = smov (!%p165_p3, %s508_s18), 3  ;;  %569 = vmatpush3.bf16.msra.mxu1 %v605_v15 }
   0xe   : > { %s574_s4 = smul.u32 12, %s720_s18  ;;  %s511_s5 = sshll.u32 %s720_s18, 2 }
   0xf   : > { %546 = vmatpush3.bf16.msra.mxu0 %v590_v6  ;;  %s175_s8 = scalar_lea.vmem %s718_s3, %s511_s5 }
  0x10   : > { %547 = vmatprep.subr.bf16.mxu0 %v591_v7  ;;  %s169_s14 = scalar_lea.vmem %s715_s0, %s574_s4 }
  0x11   : > { %v604_v14 = vld [vmem:[%s169_s14 + $0x4] ss:$12 sps:$4 sm:$0xff]   ;;  %v606_v17 = vld [vmem:[%s169_s14 + $0x8] ss:$12 sps:$4 sm:$0xff]   ;;  %v602_v21 = vld [vmem:[%s169_s14] ss:$12 sps:$4 sm:$0xff]  }
  0x12   : > { %384 = vmatprep.mubr.bf16.mxu0 %v604_v14  ;;  %571 = vmatmul.mubr.msk.bf16.vlgmr.msra.gmra.mrb[0].mxu1 %vm348_vm1, %v606_v17 }
  0x13   : > { %548 = vmatpush3.bf16.msra.mxu0 %v592_v8 }
  0x14   : > { %549 = vmatprep.subr.bf16.mxu0 %v593_v9 }
  0x17   : > { %550 = vmatpush3.bf16.msra.mxu0 %v594_v11 }
  0x18   : > { %551 = vmatprep.subr.bf16.mxu0 %v595_v12 }
  0x1b   : > { %552 = vmatpush3.bf16.msra.mxu0 %v596_v13 }
  0x1c   : > { %553 = vmatprep.subr.bf16.mxu0 %v597_v16 }
  0x1f   : > { %554 = vmatpush3.bf16.msra.mxu0 %v598_v18 }
  0x20   : > { %555 = vmatprep.subr.bf16.mxu0 %v600_v19 }
  0x23   : > { %556 = vmatpush3.bf16.msra.mxu0 %v601_v20 }
  0x26   : > { %385 = vmatmul.mubr.bf16.vlgmr.msra.gmra.mrb[0].mxu0 %v602_v21 }
  0xe5   : > { %v427_v22 = vpop.f32.mrb[0].mxu1 }
  0xe6   : > { %v572_v23 = vpop.f32.mrb[1].mxu1 }
  0xe7   : > { %v430_v24 = vpop.f32.mrb[2].mxu1 }
  0xe8   : > { %v573_v25 = vpop.f32.mrb[3].mxu1 }
  0xf9   : > { %v557_v26 = vpop.f32.mrb[0].mxu0 }
  0xfa   : > { %v558_v27 = vpop.f32.mrb[1].mxu0 }
  0xfb   : > { %v559_v29 = vadd.f32 %v558_v27, %v557_v26  ;;  %v560_v30 = vpop.f32.mrb[2].mxu0 }
  0xfc   : > { %v561_v31 = vpop.f32.mrb[3].mxu0 }
  0xfd   : > { %v387_v32 = vadd.f32 %v559_v29, %v512_v28  ;;  %v562_v33 = vadd.f32 %v561_v31, %v560_v30 }
  0xff   : > { %v428_v34 = vadd.f32 %v427_v22, %v387_v32  ;;  %v390_v35 = vadd.f32 %v562_v33, %v512_v28 }
 0x101   : > { %v434_v36 = vmax.f32 %v428_v34, 0.0  ;;  %v431_v37 = vadd.f32 %v430_v24, %v390_v35 }
 0x103   : > { %v539_v38 = vpack.c.bf16 %v434_v36, %v434_v36  ;;  %v435_v39 = vmax.f32 %v431_v37, 0.0 }
 0x105   : > { %445 = vst.msk [vmem:[%s175_s8] sm:$0xf] %vm444_vm2, %v539_v38  ;;  %v540_v40 = vpack.c.bf16 %v435_v39, %v435_v39 }
 0x107   : > { %446 = vst.msk [vmem:[%s175_s8 + $0x4] sm:$0xf] %vm444_vm2, %v540_v40 }
 0x108 PF: > { %s13_s12 = sadd.s32 1, %s613_s12  }
 0x109   : > { %p10_p4 = scmp.ge.s32.totalorder %s13_s12, 4  }
 0x10b   :  { %12 = sbr.rel (!%p10_p4) target bundleno = 1 (0x1), region = 62 }

// kernel: _lambda_.13
= control target key start
LH: loop header
LB: loop body
LE: loop exit
PB: predicated region body
PF: predicated region fallthrough
CT: control target
= control target key end

     0   :  { %9 = vsyncpa [#allocation3], 0  ;;  %s660_s0 = inlined_call_operand.vmem [shape: bf16[32,8], index: 0, kind: input, shape index: {}]   ;;  %s661_s1 = inlined_call_operand.vmem [shape: bf16[8,32], index: 1, kind: input, shape index: {}]   ;;  %s662_s2 = inlined_call_operand.vmem [shape: f32[1,32], index: 2, kind: input, shape index: {}]   ;;  %s663_s3 = inlined_call_operand.vmem [shape: f32[32,32], index: 3, kind: input, shape index: {}]   ;;  %s664_s4 = inlined_call_operand.hbm [shape: f32[32,32], index: 4, kind: output, shape index: {}]  }
   0x1   :  { %11 = vsyncpa [#allocation3 + $0x1], 0  ;;  %s549_s15 = smov 0   ;;  %s551_s16 = smov 0  }
   0x2   :  { %s553_s17 = smov 0   ;;  %s555_s18 = smov 0  }
   0x3 LB: > { %s570_s19 = sadd.s32 4294967295, %s517_s18   ;;  %s385_s20 = sadd.s32 4294967294, %s517_s18   ;;  %s517_s18 = sphi %s555_s18, %s670_s18   ;;  %s513_s17 = sphi %s553_s17, %s669_s17   ;;  %s509_s16 = sphi %s551_s16, %s668_s16   ;;  %s505_s15 = sphi %s549_s15, %s667_s15  }
   0x4   : > { %s574_s21 = sadd.s32 1, %s517_s18   ;;  %s118_s22 = sadd.s32 1, %s513_s17 }
   0x5   : > { %s115_s23 = ssub.s32 %s517_s18, %s574_s21  ;;  %p128_p0 = scmp.ne.s32.totalorder %s513_s17, %s509_s16 }
   0x6   : > { %p116_p1 = scmp.eq.s32.totalorder %s115_s23, 0  ;;  %p129_p2 = scmp.eq.s32.totalorder %s570_s19, 1 }
   0x7   : > { %p134_p3 = scmp.ne.s32.totalorder %s509_s16, %s505_s15  ;;  %p135_p4 = scmp.eq.s32.totalorder %s385_s20, 1 }
   0x8   : > { %s585_s24 = scalar_select %p116_p1, %s513_s17, %s118_s22  }
   0x9   : > { %p587_p5 = por %p129_p2, %p128_p0  ;;  %p591_p6 = por %p135_p4, %p134_p3 }
   0xa   : > { %p388_p7 = scmp.ge.s32.totalorder %s517_s18, 1  ;;  %p177_p8 = scmp.lt.s32.totalorder %s517_s18, 3 }
   0xc   : > { %p178_p9 = pnand %p388_p7, %p177_p8 }
   0xd   : > { %v224_v0 = vld [vmem:[%s661_s1] sm:$0xf] (!%p178_p9)  ;;  %vm241_vm0 = vcmask (!%p178_p9), 1043456   ;;  %s390_s29 = sshll.u32 (!%p178_p9), %s570_s19, 1  ;;  %v519_v1 = vmov (!%p178_p9), 0.0   ;;  %vm520_vm1 = vmmov (!%p178_p9), 0  }
   0xe   : > { %181 = sbr.rel (%p178_p9) target bundleno = 262 (0x106), region = 36  ;;  %405 = vmatprep.subr.bf16.mxu0 (!%p178_p9), %v519_v1  ;;  %v243_v2 = vsel (!%p178_p9), %vm241_vm0, %v224_v0, 0  ;;  %407 = vmatprep.mubr.msk.bf16.mxu0 (!%p178_p9), %vm520_vm1, %v519_v1  ;;  %p209_p10 = scmp.lt.s32.totalorder (!%p178_p9), %s390_s29, 3  ;;  %vm237_vm2 = vcmask (!%p178_p9), 64512   ;;  %v394_v4 = vld [vmem:[%s662_s2] ss:$0 sm:$0xff] (!%p178_p9) }
   0xf   : > { %406 = vmatpush3.bf16.msra.mxu0 (!%p178_p9), %v243_v2  ;;  %s205_s9 = sand.u32 (!%p178_p9), 1, %s509_s16   ;;  %s402_s22 = sshll.u32 (!%p178_p9), %s570_s19, 8  ;;  %vm294_vm3 = vcmask (!%p178_p9), 261120  }
  0x10   : > { %s389_s20 = sshll.u32 (!%p178_p9), %s205_s9, 4  ;;  %s619_s5 = scalar_lea.sflag (!%p178_p9), [#allocation3], %s205_s9 }
  0x11   : > { %s207_s23 = scalar_lea.vmem (!%p178_p9), [#allocation2], %s389_s20  ;;  %s521_s6 = smov (!%p178_p9), [#allocation2]  }
  0x12   : > { %s311_s27 = sshll.u32 (!%p178_p9), %s207_s23, 4  ;;  %s617_s27 = int_to_ptr.vmem [resolvable:$true] %s311_s27 }
  0x13   : > { %s455_s19 = scalar_lea.vmem (!%p178_p9), %s617_s27, 256 }
  0x14   : > { %p456_p11 = scmp.ne.s32.totalorder (!%p178_p9), %s617_s27, %s455_s19 }
  0x15   : > { %s672_s29 = smov (!%p209_p10, %s390_s29), 3 }
  0x16   : > { %s391_s30 = sshll.u32 %s672_s29, 2  ;;  %s393_s8 = sshll.u32 %s672_s29, 3 }
  0x17   : > { %s212_s7 = scalar_lea.vmem %s660_s0, %s391_s30  ;;  %s218_s12 = scalar_lea.vmem %s663_s3, %s393_s8 }
  0x18   : > { %v454_v3 = vld [vmem:[%s212_s7] sm:$0xff]   ;;  %v287_v10 = vld [vmem:[%s218_s12 + $0x8] sm:$0xff]  ;;  %s615_s30 = scalar_lea.hbm %s664_s4, %s402_s22  ;;  %p457_p12 = pnand %p456_p11, %p587_p5 }
  0x19   : > { %408 = vmatmul.mubr.msk.bf16.vlgmr.msra.gmra.mrb[0].mxu0 %vm237_vm2, %v454_v3  ;;  %v286_v6 = vld [vmem:[%s218_s12] sm:$0xff]  ;;  %s459_s7 = sshll.u32 %s521_s6, 4  ;;  %s460_s7 = int_to_ptr.vmem [resolvable:$false] %s459_s7 }
  0x1a   : > { %p458_p13 = pneg %p457_p12  ;;  %s461_s8 = scalar_lea.vmem %s460_s7, 512 }
  0x1b   : > { %p462_p0 = scmp.lt.s32.totalorder %s617_s27, %s460_s7  ;;  %p463_p1 = scmp.lt.s32.totalorder %s461_s8, %s455_s19 }
  0x1d   : > { %p464_p2 = por %p463_p1, %p462_p0 }
  0x1f   : > { %p465_p3 = pnand %p464_p2, %p458_p13 }
  0xec   : > { %v279_v5 = vpop.f32.mrb[0].mxu0 }
  0xed   : > { %v280_v7 = vadd.f32 %v394_v4, %v279_v5  ;;  %v409_v8 = vpop.f32.mrb[1].mxu0 }
  0xee   : > { %v282_v9 = vpop.f32.mrb[2].mxu0 }
  0xef   : > { %v288_v11 = vadd.f32 %v286_v6, %v280_v7  ;;  %v283_v12 = vadd.f32 %v394_v4, %v282_v9  ;;  %v410_v13 = vpop.f32.mrb[3].mxu0 }
  0xf1   : > { %v290_v14 = vmul.f32 0.01, %v288_v11  ;;  %v289_v15 = vadd.f32 %v287_v10, %v283_v12 }
  0xf3   : > { %v292_v16 = vmax.f32 %v288_v11, %v290_v14  ;;  %v291_v17 = vmul.f32 0.01, %v289_v15 }
  0xf5   : > { %295 = vst.msk [vmem:[%s207_s23] sm:$0xff] %vm294_vm3, %v292_v16  ;;  %v293_v18 = vmax.f32 %v289_v15, %v291_v17 }
  0xf7   : > { %296 = vst.msk [vmem:[%s207_s23 + $0x8] sm:$0xff] %vm294_vm3, %v293_v18 }
  0xf8   : > { %468 = shalt.err (!%p465_p3)
}
  0xf9   : > { %s469_s9 = scalar_lea.hbm %s615_s30, 256  ;;  %s473_s12 = scalar_lea.hbm %s664_s4, 512 }
  0xfa   : > { %p470_p4 = scmp.ne.s32.totalorder %s615_s30, %s469_s9  ;;  %p474_p9 = scmp.lt.u32.totalorder %s615_s30, %s664_s4 }
  0xfb   : > { %p475_p10 = scmp.lt.u32.totalorder %s473_s12, %s469_s9  ;;  %p477_p12 = scmp.lt.u32.totalorder %s469_s9, %s615_s30 }
  0xfc   : > { %p471_p7 = pnand %p470_p4, %p587_p5 }
  0xfd   : > { %p476_p11 = por %p475_p10, %p474_p9 }
  0xfe   : > { %p472_p8 = pneg %p471_p7 }
  0xff   : > { %p478_p13 = por %p477_p12, %p476_p11 }
 0x101   : > { %p479_p0 = pnand %p478_p13, %p472_p8 }
 0x103   : > { %482 = shalt.err (!%p479_p0)
}
 0x104   : > { %s522_s20 = smov 128   ;;  %s523_s22 = smov 8  }
 0x105   : > { %411 = dma.vmem_to_hbm [thread:$0]  (%p587_p5), %s617_s27, 256, %s615_s30, %s619_s5, %s522_s20, %s522_s20, %s523_s22  }
 0x106 PF: > { %p417_p1 = scmp.ge.s32.totalorder %s517_s18, 2  ;;  %s326_s23 = sand.u32 1, %s505_s15  }
 0x107   : > { %s327_s28 = scalar_lea.sflag [#allocation3], %s326_s23 }
 0x108   : > { %p414_p2 = pnand %p417_p1, %p591_p6 }
 0x10a   : > { %500 = dma.done.wait (!%p414_p2), %s327_s28, 256  }
 0x10b   : > { %502 = vsyncadd (!%p414_p2), %s327_s28, 4294967040  ;;  %p14_p3 = scmp.ge.s32.totalorder %s574_s21, 4   ;;  %s667_s15 = smov %s509_s16 }
 0x10c   : > { %s668_s16 = smov %s513_s17  ;;  %s669_s17 = smov %s585_s24 }
 0x10d   : > { %s670_s18 = smov %s574_s21  ;;  %16 = sbr.rel (!%p14_p3) target bundleno = 3 (0x3), region = 74 }
 0x114   :  { %332 = vsyncpa [#allocation3], 1 }
 0x115   :  { %334 = vsyncpa [#allocation3 + $0x1], 1 }

// kernel: _lambda_.9
= control target key start
LH: loop header
LB: loop body
LE: loop exit
PB: predicated region body
PF: predicated region fallthrough
CT: control target
= control target key end

     0   :  { %s960_s18 = smov 0   ;;  %s1130_s0 = inlined_call_operand.vmem [shape: bf16[32,288], index: 0, kind: input, shape index: {}]   ;;  %s1131_s1 = inlined_call_operand.vmem [shape: bf16[288,128], index: 1, kind: input, shape index: {}]   ;;  %s1132_s2 = inlined_call_operand.vmem [shape: bf16[32,4], index: 2, kind: input, shape index: {}]   ;;  %s1133_s3 = inlined_call_operand.vmem [shape: f32[1,4], index: 3, kind: input, shape index: {}]   ;;  %s1134_s4 = inlined_call_operand.vmem [shape: f32[1,32], index: 4, kind: input, shape index: {}]   ;;  %s1135_s5 = inlined_call_operand.vmem [shape: bf16[32,32], index: 5, kind: output, shape index: {}]  }
   0x1 LB: > { %s765_s19 = sadd.s32 4294967295, %s913_s18   ;;  %p769_p0 = scmp.ge.s32.totalorder %s913_s18, 1  ;;  %s913_s18 = sphi %s960_s18, %s15_s18  }
   0x2   : > { %p189_p1 = scmp.lt.s32.totalorder %s913_s18, 3 }
   0x4   : > { %p190_p2 = pnand %p769_p0, %p189_p1 }
   0x5   : > { %v883_v0 = vld [vmem:[%s1132_s2] sm:$0xff] (!%p190_p2)   ;;  %v915_v1 = vmov (!%p190_p2), 0.0   ;;  %v884_v2 = vld [vmem:[%s1132_s2 + $0x8] sm:$0xff] (!%p190_p2)   ;;  %vm916_vm0 = vmmov (!%p190_p2), 0   ;;  %s770_s24 = sshll.u32 (!%p190_p2), %s765_s19, 1  ;;  %vm264_vm1 = vcmask (!%p190_p2), 261120  }
   0x6   : > { %193 = sbr.rel (%p190_p2) target bundleno = 875 (0x36b), region = 40  ;;  %835 = vmatprep.subr.bf16.mxu0 (!%p190_p2), %v915_v1  ;;  %839 = vmatprep.mubr.msk.bf16.mxu0 (!%p190_p2), %vm916_vm0, %v915_v1  ;;  %p219_p3 = scmp.lt.s32.totalorder (!%p190_p2), %s770_s24, 3  ;;  %v774_v4 = vld [vmem:[%s1133_s3] ss:$0 sm:$0xff] (!%p190_p2)  ;;  %vm309_vm2 = vcmask (!%p190_p2), 31744   ;;  %v889_v15 = vld [vmem:[%s1131_s1 + $0x48] sm:$0xff] (!%p190_p2)  }
   0x7   : > { %836 = vmatpush3.bf16.msra.mxu0 (!%p190_p2), %v883_v0  ;;  %v887_v13 = vld [vmem:[%s1131_s1 + $0x40] sm:$0xff] (!%p190_p2)   ;;  %v890_v16 = vld [vmem:[%s1131_s1 + $0x8] sm:$0xff] (!%p190_p2)   ;;  %v891_v17 = vld [vmem:[%s1131_s1 + $0x50] sm:$0xff] (!%p190_p2)   ;;  %v917_v35 = vmov (!%p190_p2), 0   ;;  %s918_s21 = smov (!%p190_p2), 127   ;;  %s919_s22 = smov (!%p190_p2), 126  }
   0x8   : > { %837 = vmatprep.subr.bf16.mxu0 (!%p190_p2), %v915_v1  ;;  %v888_v14 = vld [vmem:[%s1131_s1] sm:$0xff] (!%p190_p2)   ;;  %810 = vmatprep.subr.bf16.mxu1 (!%p190_p2), %v887_v13  ;;  %v892_v18 = vld [vmem:[%s1131_s1 + $0x10] sm:$0xff] (!%p190_p2)   ;;  %v893_v19 = vld [vmem:[%s1131_s1 + $0x58] sm:$0xff] (!%p190_p2)   ;;  %v920_v38 = vmov (!%p190_p2), 1   ;;  %vm921_vm5 = vmmov (!%p190_p2), 1   ;;  %s923_s23 = smov (!%p190_p2), 2  }
   0x9   : > { %811 = vmatpush3.bf16.msra.mxu1 (!%p190_p2), %v888_v14  ;;  %v894_v20 = vld [vmem:[%s1131_s1 + $0x18] sm:$0xff] (!%p190_p2)   ;;  %v902_v21 = vld [vmem:[%s1131_s1 + $0x80] sm:$0xff] (!%p190_p2)   ;;  %v905_v23 = vld [vmem:[%s1131_s1 + $0x88] sm:$0xff] (!%p190_p2)   ;;  %875 = vset.pattern.permute.xlu1 (!%p190_p2), %v920_v38  ;;  %s927_s26 = smov (!%p190_p2), 96   ;;  %s928_s27 = smov (!%p190_p2), 64  }
   0xa   : > { %812 = vmatprep.subr.bf16.mxu1 (!%p190_p2), %v889_v15  ;;  %v895_v22 = vld [vmem:[%s1131_s1 + $0x60] sm:$0xff] (!%p190_p2)   ;;  %v897_v25 = vld [vmem:[%s1131_s1 + $0x68] sm:$0xff] (!%p190_p2)   ;;  %v899_v28 = vld [vmem:[%s1131_s1 + $0x70] sm:$0xff] (!%p190_p2)   ;;  %876 = vset.pattern.permute.xlu0 (!%p190_p2), %v920_v38  ;;  %s929_s29 = smov (!%p190_p2), 32  }
   0xb   : > { %838 = vmatpush3.bf16.msra.mxu0 (!%p190_p2), %v884_v2  ;;  %v896_v24 = vld [vmem:[%s1131_s1 + $0x20] sm:$0xff] (!%p190_p2)   ;;  %v898_v27 = vld [vmem:[%s1131_s1 + $0x28] sm:$0xff] (!%p190_p2)   ;;  %v900_v29 = vld [vmem:[%s1131_s1 + $0x30] sm:$0xff] (!%p190_p2)  }
   0xc   : > { %843 = vmatprep.subr.bf16.mxu0 (!%p190_p2), %v915_v1  ;;  %v901_v30 = vld [vmem:[%s1131_s1 + $0x78] sm:$0xff] (!%p190_p2)  }
   0xd   : > { %s1141_s24 = smov (!%p219_p3, %s770_s24), 3  ;;  %813 = vmatpush3.bf16.msra.mxu1 %v890_v16  ;;  %v903_v31 = vld [vmem:[%s1131_s1 + $0x38] sm:$0xff]  }
   0xe   : > { %s851_s25 = smul.u32 12, %s1141_s24  ;;  %814 = vmatprep.subr.bf16.mxu1 %v891_v17  ;;  %s773_s7 = sshll.u32 %s1141_s24, 2 }
   0xf   : > { %s229_s10 = scalar_lea.vmem %s1135_s5, %s773_s7 }
  0x10   : > { %s980_s28 = scalar_lea.vmem %s1130_s0, %s851_s25  ;;  %s924_s25 = smov 3  }
  0x11   : > { %v885_v3 = vld [vmem:[%s980_s28 + $0x4] ss:$12 sps:$4 sm:$0xff]   ;;  %815 = vmatpush3.bf16.msra.mxu1 %v892_v18  ;;  %v906_v26 = vld [vmem:[%s980_s28 + $0x8] ss:$12 sps:$4 sm:$0xff]   ;;  %v904_v32 = vld [vmem:[%s980_s28] ss:$12 sps:$4 sm:$0xff]  }
  0x12   : > { %840 = vmatmul.mubr.msk.bf16.vlgmr.msra.gmra.mrb[0].mxu0 %vm264_vm1, %v885_v3  ;;  %505 = vmatprep.mubr.bf16.mxu1 %v885_v3  ;;  %s922_s28 = smov 1   ;;  %v925_v3 = vmov 2  }
  0x13   : > { %847 = vmatprep.mubr.msk.bf16.mxu0 %vm916_vm0, %v915_v1  ;;  %816 = vmatprep.subr.bf16.mxu1 %v893_v19 }
  0x14   : > { %844 = vmatpush3.bf16.msra.mxu0 %v902_v21 }
  0x15   : > { %845 = vmatprep.subr.bf16.mxu0 %v915_v1  ;;  %817 = vmatpush3.bf16.msra.mxu1 %v894_v20 }
  0x16   : > { %818 = vmatprep.subr.bf16.mxu1 %v895_v22 }
  0x18   : > { %846 = vmatpush3.bf16.msra.mxu0 %v905_v23 }
  0x19   : > { %819 = vmatpush3.bf16.msra.mxu1 %v896_v24 }
  0x1a   : > { %820 = vmatprep.subr.bf16.mxu1 %v897_v25 }
  0x1b   : > { %848 = vmatmul.mubr.msk.bf16.vlgmr.msra.gmra.mrb[4].mxu0 %vm264_vm1, %v906_v26 }
  0x1d   : > { %821 = vmatpush3.bf16.msra.mxu1 %v898_v27 }
  0x1e   : > { %822 = vmatprep.subr.bf16.mxu1 %v899_v28 }
  0x21   : > { %823 = vmatpush3.bf16.msra.mxu1 %v900_v29 }
  0x22   : > { %824 = vmatprep.subr.bf16.mxu1 %v901_v30 }
  0x25   : > { %825 = vmatpush3.bf16.msra.mxu1 %v903_v31 }
  0x28   : > { %506 = vmatmul.mubr.bf16.vlgmr.msra.gmra.mrb[0].mxu1 %v904_v32 }
  0xe5   : > { %v302_v5 = vpop.f32.mrb[0].mxu0 }
  0xe6   : > { %v303_v6 = vadd.f32 %v774_v4, %v302_v5  ;;  %v841_v7 = vpop.f32.mrb[1].mxu0 }
  0xe7   : > { %v305_v8 = vpop.f32.mrb[2].mxu0 }
  0xe8   : > { %v306_v9 = vadd.f32 %v774_v4, %v305_v8  ;;  %v842_v10 = vpop.f32.mrb[3].mxu0  ;;  %v310_v11 = vsel %vm309_vm2, %v303_v6, -inf  ;;  %v926_v4 = vmov 3  }
  0xe9   : > { %311 = vmax.xlane.f32.xlu0 %v310_v11 }
  0xea   : > { %v313_v12 = vsel %vm309_vm2, %v306_v9, -inf }
  0xed   : > { %314 = vmax.xlane.f32.xlu0 %v313_v12 }
  0xee   : > { %v548_v49 = vpop.f32.mrb[4].mxu0 }
  0xef   : > { %v849_v50 = vpop.f32.mrb[5].mxu0 }
  0xf0   : > { %v551_v63 = vpop.f32.mrb[6].mxu0 }
  0xf1   : > { %v850_v2 = vpop.f32.mrb[7].mxu0 }
  0xfb   : > { %v826_v51 = vpop.f32.mrb[0].mxu1 }
  0xfc   : > { %v827_v55 = vpop.f32.mrb[1].mxu1 }
  0xfd   : > { %v828_v56 = vadd.f32 %v827_v55, %v826_v51  ;;  %v829_v57 = vpop.f32.mrb[2].mxu1 }
  0xfe   : > { %v830_v58 = vpop.f32.mrb[3].mxu1 }
  0xff   : > { %v1089_v60 = vadd.f32 %v828_v56, %v548_v49  ;;  %v831_v61 = vadd.f32 %v830_v58, %v829_v57 }
 0x101   : > { %v1094_v1 = vadd.f32 %v831_v61, %v551_v63 }
 0x176   : > { %v312_v33 = vpop.xlane.xlu0 %311 }
 0x177   : > { %vm1044_vm3 = vcmp.ge.f32.partialorder %v303_v6, %v312_v33 }
 0x178   : > { %v1051_v36 = vsel %vm1044_vm3, 1, %v917_v35  ;;  %vm571_vm6 = vmxor %vm1044_vm3, %vm921_vm5 }
 0x179   : > { %605 = vrot.lane.b32.xlu1 %v1051_v36, %s918_s21  ;;  %647 = vrot.lane.b32.xlu0 %v1051_v36, %s919_s22  ;;  %v573_v41 = vsel %vm571_vm6, 1, %v917_v35 }
 0x17a   : > { %v315_v37 = vpop.xlane.xlu0 %314 }
 0x17b   : > { %vm1055_vm4 = vcmp.ge.f32.partialorder %v306_v9, %v315_v37  ;;  %v800_v37 = vld [vmem:[%s1134_s4] ss:$0 sm:$0xff] }
 0x17c   : > { %v1062_v40 = vsel %vm1055_vm4, 1, %v917_v35  ;;  %vm572_vm7 = vmxor %vm1055_vm4, %vm921_vm5 }
 0x17d   : > { %607 = vrot.lane.b32.xlu1 %v1062_v40, %s918_s21  ;;  %v574_v42 = vsel %vm572_vm7, 1, %v917_v35 }
 0x181   : > { %649 = vrot.lane.b32.xlu1 %v1062_v40, %s919_s22 }
 0x185   : > { %575 = vrot.lane.b32.xlu1 %v573_v41, %s922_s28 }
 0x189   : > { %577 = vrot.lane.b32.xlu1 %v574_v42, %s922_s28 }
 0x1eb   : > { %v606_v43 = vpop.permute.xlu1 %605  ;;  %v648_v44 = vpop.permute.xlu0 %647 }
 0x1ec   : > { %vm609_vm8 = vcmp.ne.s32.totalorder %v606_v43, 0  ;;  %vm651_vm10 = vcmp.ne.s32.totalorder %v648_v44, 0 }
 0x1ed   : > { %vm611_vm9 = vmor %vm1044_vm3, %vm609_vm8 }
 0x1ee   : > { %vm613_vm11 = vmxor %vm611_vm9, %vm921_vm5 }
 0x1ef   : > { %v608_v45 = vpop.permute.xlu1 %607  ;;  %v615_v46 = vsel %vm613_vm11, 1, %v917_v35  ;;  %vm653_vm12 = vmor %vm611_vm9, %vm651_vm10 }
 0x1f0   : > { %vm610_vm13 = vcmp.ne.s32.totalorder %v608_v45, 0  ;;  %617 = vrot.lane.b32.xlu1 %v615_v46, %s923_s23  ;;  %vm655_vm0 = vmxor %vm653_vm12, %vm921_vm5 }
 0x1f1   : > { %vm612_vm14 = vmor %vm1055_vm4, %vm610_vm13  ;;  %v657_v54 = vsel %vm655_vm0, 1, %v917_v35 }
 0x1f2   : > { %vm614_vm15 = vmxor %vm612_vm14, %vm921_vm5 }
 0x1f3   : > { %v650_v47 = vpop.permute.xlu1 %649  ;;  %v616_v48 = vsel %vm614_vm15, 1, %v917_v35 }
 0x1f4   : > { %vm652_vm1 = vcmp.ne.s32.totalorder %v650_v47, 0  ;;  %619 = vrot.lane.b32.xlu1 %v616_v48, %s923_s23 }
 0x1f5   : > { %vm654_vm2 = vmor %vm612_vm14, %vm652_vm1 }
 0x1f6   : > { %vm656_vm6 = vmxor %vm654_vm2, %vm921_vm5 }
 0x1f7   : > { %v576_v52 = vpop.permute.xlu1 %575  ;;  %v658_v53 = vsel %vm656_vm6, 1, %v917_v35 }
 0x1f8   : > { %vm579_vm7 = vcmp.ne.s32.totalorder %v576_v52, 0  ;;  %661 = vrot.lane.b32.xlu0 %v658_v53, %s924_s25  ;;  %659 = vrot.lane.b32.xlu1 %v657_v54, %s924_s25 }
 0x1f9   : > { %vm581_vm8 = vmand %vm1044_vm3, %vm579_vm7 }
 0x1fa   : > { %v583_v59 = vsel %vm581_vm8, 1, %v917_v35 }
 0x1fb   : > { %v578_v62 = vpop.permute.xlu1 %577 }
 0x1fc   : > { %vm580_vm5 = vcmp.ne.s32.totalorder %v578_v62, 0  ;;  %586 = vperm.xlu1 %875, %v583_v59  }
 0x1fd   : > { %vm582_vm9 = vmand %vm1055_vm4, %vm580_vm5 }
 0x1fe   : > { %v584_v0 = vsel %vm582_vm9, 1, %v917_v35 }
 0x1ff   : > { %589 = vperm.xlu0 %876, %v584_v0  }
 0x200   : > { %877 = vset.pattern.permute.xlu1 %v925_v3 }
 0x203   : > { %878 = vset.pattern.permute.xlu0 %v926_v4 }
 0x262   : > { %v618_v5 = vpop.permute.xlu1 %617 }
 0x263   : > { %vm621_vm10 = vcmp.ne.s32.totalorder %v618_v5, 0 }
 0x264   : > { %vm623_vm11 = vmand %vm1044_vm3, %vm621_vm10  ;;  %vm706_vm10 = vcmask 257024  }
 0x265   : > { %v625_v6 = vsel %vm623_vm11, 1, %v917_v35 }
 0x266   : > { %v620_v7 = vpop.permute.xlu1 %619  ;;  %628 = vperm.xlu1 %877, %v625_v6  }
 0x267   : > { %vm622_vm12 = vcmp.ne.s32.totalorder %v620_v7, 0 }
 0x268   : > { %vm624_vm13 = vmand %vm1055_vm4, %vm622_vm12 }
 0x269   : > { %v626_v8 = vsel %vm624_vm13, 1, %v917_v35 }
 0x26a   : > { %631 = vperm.xlu1 %877, %v626_v8   ;;  %v660_v9 = vpop.permute.xlu1 %659  ;;  %v662_v10 = vpop.permute.xlu0 %661 }
 0x26b   : > { %vm663_vm14 = vcmp.ne.s32.totalorder %v660_v9, 0  ;;  %vm664_vm15 = vcmp.ne.s32.totalorder %v662_v10, 0 }
 0x26c   : > { %vm665_vm0 = vmand %vm1044_vm3, %vm663_vm14 }
 0x26d   : > { %vm666_vm1 = vmand %vm1055_vm4, %vm664_vm15  ;;  %v667_v11 = vsel %vm665_vm0, 1, %v917_v35 }
 0x26e   : > { %879 = vset.pattern.permute.xlu1 %v926_v4  ;;  %670 = vperm.xlu0 %878, %v667_v11   ;;  %v668_v12 = vsel %vm666_vm1, 1, %v917_v35 }
 0x26f   : > { %673 = vperm.xlu1 %879, %v668_v12  }
 0x272   : > { %881 = vset.pattern.permute.xlu0 %v917_v35 }
 0x273   : > { %563 = vperm.xlu0 %881, %v1062_v40   ;;  %880 = vset.pattern.permute.xlu1 %v917_v35 }
 0x274   : > { %560 = vperm.xlu1 %880, %v1051_v36  }
 0x277   : > { %882 = vset.pattern.permute.xlu0 %v926_v4 }
 0x27b   : > { %v587_v13 = vpop.permute.xlu1 %586 }
 0x27c   : > { %vm591_vm3 = vcmp.eq.s32.totalorder %v587_v13, 1 }
 0x27d   : > { %v593_v14 = vsel %vm591_vm3, %v1089_v60, 0.0 }
 0x27e   : > { %v590_v15 = vpop.permute.xlu0 %589  ;;  %597 = vrot.lane.b32.xlu1 %v593_v14, %s927_s26 }
 0x27f   : > { %vm592_vm4 = vcmp.eq.s32.totalorder %v590_v15, 1 }
 0x280   : > { %v594_v16 = vsel %vm592_vm4, %v1094_v1, 0.0 }
 0x282   : > { %599 = vrot.lane.b32.xlu1 %v594_v16, %s927_s26 }
 0x2e5   : > { %v629_v17 = vpop.permute.xlu1 %628 }
 0x2e6   : > { %vm633_vm2 = vcmp.eq.s32.totalorder %v629_v17, 1 }
 0x2e7   : > { %v635_v18 = vsel %vm633_vm2, %v1089_v60, 0.0 }
 0x2e8   : > { %639 = vrot.lane.b32.xlu0 %v635_v18, %s928_s27 }
 0x2e9   : > { %v632_v19 = vpop.permute.xlu1 %631 }
 0x2ea   : > { %vm634_vm6 = vcmp.eq.s32.totalorder %v632_v19, 1 }
 0x2eb   : > { %v636_v20 = vsel %vm634_vm6, %v1094_v1, 0.0 }
 0x2ec   : > { %641 = vrot.lane.b32.xlu1 %v636_v20, %s928_s27 }
 0x2ed   : > { %v671_v21 = vpop.permute.xlu0 %670 }
 0x2ee   : > { %vm675_vm7 = vcmp.eq.s32.totalorder %v671_v21, 1  ;;  %v674_v22 = vpop.permute.xlu1 %673 }
 0x2ef   : > { %v677_v23 = vsel %vm675_vm7, %v1089_v60, 0.0  ;;  %vm676_vm8 = vcmp.eq.s32.totalorder %v674_v22, 1 }
 0x2f0   : > { %v678_v24 = vsel %vm676_vm8, %v1094_v1, 0.0  ;;  %681 = vrot.lane.b32.xlu0 %v677_v23, %s929_s29 }
 0x2f1   : > { %683 = vrot.lane.b32.xlu1 %v678_v24, %s929_s29 }
 0x2f2   : > { %v564_v27 = vpop.permute.xlu0 %563 }
 0x2f3   : > { %v561_v25 = vpop.permute.xlu1 %560  ;;  %vm566_vm9 = vcmp.eq.s32.totalorder %v564_v27, 1 }
 0x2f4   : > { %vm565_vm5 = vcmp.eq.s32.totalorder %v561_v25, 1  ;;  %v568_v33 = vsel %vm566_vm9, %v1094_v1, 0.0 }
 0x2f5   : > { %v567_v29 = vsel %vm565_vm5, %v1089_v60, 0.0 }
 0x2f7   : > { %v598_v26 = vpop.permute.xlu1 %597 }
 0x2f8   : > { %v603_v32 = vadd.f32 %v598_v26, %v567_v29 }
 0x2fb   : > { %v600_v28 = vpop.permute.xlu1 %599 }
 0x2fc   : > { %v604_v34 = vadd.f32 %v600_v28, %v568_v33 }
 0x35a   : > { %v640_v30 = vpop.permute.xlu0 %639 }
 0x35b   : > { %v645_v35 = vadd.f32 %v640_v30, %v603_v32 }
 0x35e   : > { %v642_v31 = vpop.permute.xlu1 %641 }
 0x35f   : > { %v646_v36 = vadd.f32 %v642_v31, %v604_v34 }
 0x362   : > { %v682_v38 = vpop.permute.xlu0 %681 }
 0x363   : > { %v687_v39 = vadd.f32 %v682_v38, %v645_v35  ;;  %v684_v40 = vpop.permute.xlu1 %683 }
 0x364   : > { %v688_v41 = vadd.f32 %v684_v40, %v646_v36 }
 0x365   : > { %v696_v42 = vadd.f32 %v800_v37, %v687_v39 }
 0x366   : > { %v697_v43 = vadd.f32 %v800_v37, %v688_v41 }
 0x367   : > { %v805_v44 = vpack.c.bf16 %v696_v42, %v696_v42 }
 0x368   : > { %v806_v45 = vpack.c.bf16 %v697_v43, %v697_v43 }
 0x369   : > { %707 = vst.msk [vmem:[%s229_s10] sm:$0xf] %vm706_vm10, %v805_v44 }
 0x36a   : > { %708 = vst.msk [vmem:[%s229_s10 + $0x4] sm:$0xf] %vm706_vm10, %v806_v45 }
 0x36b PF: > { %s15_s18 = sadd.s32 1, %s913_s18  }
 0x36c   : > { %p12_p4 = scmp.ge.s32.totalorder %s15_s18, 4  }
 0x36e   :  { %14 = sbr.rel (!%p12_p4) target bundleno = 1 (0x1), region = 70 }

</bundles_post_ra>
